<compile_context>
chip_gen: v7x
topology: tpu7x:2x2x1
jax: 0.10.0
libtpu: 0.0.40
codegen_flags: <defaults>
</compile_context>

<pallas_src>
import functools

import jax
import jax.numpy as jnp
from jax import lax
from jax.experimental import pallas as pl
from jax.experimental.pallas import tpu as pltpu


def _pick_divisor(total, preferred):
    """Largest value in `preferred` that evenly divides `total`, else `total`."""
    for p in preferred:
        if p <= total and total % p == 0:
            return p
    return total


# ---------------------------------------------------------------------------
# Pallas kernels
# ---------------------------------------------------------------------------
def _conv_fused_kernel(x_ref, w_ref, *rest, use_in, leaky, eps):
    """One (n, cout-tile, k-tile) grid step of conv-as-matmul with fused epilogue.

    x_ref : (1, tk, HW) bf16   im2col patches of sample n, K-chunk k
    w_ref : (tc, tk)    bf16   weight chunk
    rest  : [bias_ref] or [gamma_ref, beta_ref], then o_ref (1, tc, HW), acc scratch.
    """
    if use_in:
        g_ref, b_ref, o_ref, acc_ref = rest
    else:
        bias_ref, o_ref, acc_ref = rest

    k = pl.program_id(2)

    @pl.when(k == 0)
    def _():
        acc_ref[...] = jnp.zeros_like(acc_ref)

    # (tc, tk) @ (tk, HW) -> (tc, HW), f32 accumulate on the MXU.
    acc_ref[...] += jnp.dot(w_ref[...], x_ref[0],
                            preferred_element_type=jnp.float32)

    @pl.when(k == pl.num_programs(2) - 1)
    def _():
        y = acc_ref[...]                                   # (tc, HW) f32
        if use_in:
            # InstanceNorm2d: biased variance, eps=1e-5, affine (PyTorch semantics).
            mu = jnp.mean(y, axis=-1, keepdims=True)
            yc = y - mu
            var = jnp.mean(yc * yc, axis=-1, keepdims=True)
            y = yc * lax.rsqrt(var + eps)
            y = y * g_ref[...] + b_ref[...]
        else:
            y = y + bias_ref[...]
        if leaky:
            y = jnp.where(y >= 0.0, y, 0.2 * y)            # LeakyReLU(0.2)
        o_ref[0] = y.astype(o_ref.dtype)


def _linear_kernel(z_ref, w_ref, b_ref, o_ref):
    o_ref[...] = (jnp.dot(z_ref[...], w_ref[...],
                          preferred_element_type=jnp.float32)
                  + b_ref[...]).astype(o_ref.dtype)


# ---------------------------------------------------------------------------
# Wrappers around pallas_call
# ---------------------------------------------------------------------------
def conv2d_fused(x, w, *, stride, pad, bias=None, gamma=None, beta=None,
                 leaky=False, eps=1e-5):
    """Conv2d [+ InstanceNorm2d(affine)] [+ LeakyReLU(0.2)] as one Pallas kernel.

    x: (N, Cin, H, W) f32,  w: (Cout, Cin, KH, KW) f32  ->  (N, Cout, OH, OW) f32.
    """
    N, Cin, H, W = x.shape
    Cout, _, KH, KW = w.shape
    OH = (H + 2 * pad - KH) // stride + 1
    OW = (W + 2 * pad - KW) // stride + 1
    HW = OH * OW
    K = Cin * KH * KW
    use_in = gamma is not None

    # im2col as ONE fused XLA op, in bf16, already in transposed (N, K, HW) layout.
    # Feature ordering of conv_general_dilated_patches is cin-major, then (kh, kw)
    # row-major -> matches torch weight.reshape(Cout, Cin*KH*KW).
    patches = lax.conv_general_dilated_patches(
        x.astype(jnp.bfloat16), (KH, KW), (stride, stride),
        padding=((pad, pad), (pad, pad)),
        dimension_numbers=("NCHW", "OIHW", "NCHW"))
    patches = patches.reshape(N, K, HW)
    wmat = w.reshape(Cout, K).astype(jnp.bfloat16)

    # Tiling: bound K chunks (VMEM on v7x) and split Cout when possible (2 TCs).
    tk = K if K <= 512 else _pick_divisor(K, [512, 384, 256, 128])
    n_k = K // tk
    tc = Cout // 2 if (Cout % 16 == 0) else Cout
    n_c = Cout // tc

    in_specs = [
        pl.BlockSpec((1, tk, HW), lambda n, c, k: (n, k, 0)),
        pl.BlockSpec((tc, tk), lambda n, c, k: (c, k)),
    ]
    args = [patches, wmat]
    if use_in:
        in_specs += [pl.BlockSpec((tc, 1), lambda n, c, k: (c, 0)),
                     pl.BlockSpec((tc, 1), lambda n, c, k: (c, 0))]
        args += [gamma.reshape(Cout, 1).astype(jnp.float32),
                 beta.reshape(Cout, 1).astype(jnp.float32)]
    else:
        b = jnp.zeros((Cout,), jnp.float32) if bias is None else bias
        in_specs += [pl.BlockSpec((tc, 1), lambda n, c, k: (c, 0))]
        args += [b.reshape(Cout, 1).astype(jnp.float32)]

    flops = 2 * N * Cout * K * HW
    bytes_accessed = patches.size * 2 + wmat.size * 2 + N * Cout * HW * 4

    out = pl.pallas_call(
        functools.partial(_conv_fused_kernel, use_in=use_in, leaky=leaky, eps=eps),
        out_shape=jax.ShapeDtypeStruct((N, Cout, HW), jnp.float32),
        grid=(N, n_c, n_k),
        in_specs=in_specs,
        out_specs=pl.BlockSpec((1, tc, HW), lambda n, c, k: (n, c, 0)),
        scratch_shapes=[pltpu.VMEM((tc, HW), jnp.float32)],
        compiler_params=pltpu.CompilerParams(
            dimension_semantics=("parallel", "parallel", "arbitrary"),
            vmem_limit_bytes=32 * 1024 * 1024),
        cost_estimate=pl.CostEstimate(flops=flops, transcendentals=0,
                                      bytes_accessed=bytes_accessed),
    )(*args)
    return out.reshape(N, Cout, OH, OW)


def linear(z, w, b):
    """y = z @ w.T + b.  z: (B, L), w: (F, L), b: (F,) -> (B, F), F on lanes."""
    B, L = z.shape
    F = w.shape[0]
    tn = _pick_divisor(F, [2048, 1024, 512, 256, 128])
    grid = (F // tn,)
    out = pl.pallas_call(
        _linear_kernel,
        out_shape=jax.ShapeDtypeStruct((B, F), jnp.float32),
        grid=grid,
        in_specs=[
            pl.BlockSpec((B, L), lambda j: (0, 0)),
            pl.BlockSpec((L, tn), lambda j: (0, j)),
            pl.BlockSpec((1, tn), lambda j: (0, j)),
        ],
        out_specs=pl.BlockSpec((B, tn), lambda j: (0, j)),
        compiler_params=pltpu.CompilerParams(
            dimension_semantics=("parallel",),
            vmem_limit_bytes=32 * 1024 * 1024),
        cost_estimate=pl.CostEstimate(flops=2 * B * L * F, transcendentals=0,
                                      bytes_accessed=z.size * 2 + w.size * 2 + B * F * 4),
    )(z.astype(jnp.bfloat16), w.T.astype(jnp.bfloat16),
      b.reshape(1, F).astype(jnp.float32))
    return out


# ---------------------------------------------------------------------------
# Module: parameters + forward
# ---------------------------------------------------------------------------
def init_params(key, num_classes, image_size, latent_size, img_channel, dis_dim):
    ks = jax.random.split(key, 10)
    hw = image_size * image_size

    def nrm(k, shape, scale=0.05):
        return (scale * jax.random.normal(k, shape)).astype(jnp.float32)

    p = {}
    p["lin_w"] = nrm(ks[0], (hw, latent_size))            # Linear(latent, H*W)
    p["lin_b"] = nrm(ks[1], (hw,))
    p["emb"] = nrm(ks[2], (num_classes, hw), 1.0)         # Embedding(num_classes, H*W)
    cin = img_channel + 2
    p["c1_w"] = nrm(ks[3], (dis_dim, cin, 4, 4))
    p["c1_b"] = nrm(ks[4], (dis_dim,))
    p["c2_w"] = nrm(ks[5], (dis_dim * 2, dis_dim, 4, 4))
    p["in2_g"] = jnp.ones((dis_dim * 2,), jnp.float32)
    p["in2_b"] = jnp.zeros((dis_dim * 2,), jnp.float32)
    p["c3_w"] = nrm(ks[6], (dis_dim * 4, dis_dim * 2, 4, 4))
    p["in3_g"] = jnp.ones((dis_dim * 4,), jnp.float32)
    p["in3_b"] = jnp.zeros((dis_dim * 4,), jnp.float32)
    p["c4_w"] = nrm(ks[7], (dis_dim * 8, dis_dim * 4, 4, 4))
    p["in4_g"] = jnp.ones((dis_dim * 8,), jnp.float32)
    p["in4_b"] = jnp.zeros((dis_dim * 8,), jnp.float32)
    p["c5_w"] = nrm(ks[8], (1, dis_dim * 8, 4, 4))
    p["c5_b"] = nrm(ks[9], (1,))
    return p


def discriminator1block_forward(params, img, labels, semantic_latent, image_size):
    bs = img.shape[0]
    H = W = image_size

    # latent_joining(z).view(bs, 1, H, W)   -- Pallas matmul (H*W on lanes)
    feat = linear(semantic_latent, params["lin_w"], params["lin_b"])
    feature_plate = feat.reshape(bs, 1, H, W)

    # embedding lookup (XLA gather) .view(bs, 1, H, W)
    embedding = params["emb"][labels].reshape(bs, 1, H, W)

    # channel concat -> (bs, img_channel + 2, H, W)
    x = jnp.concatenate([img, feature_plate, embedding], axis=1)

    # conv stack: one fused Pallas kernel per layer
    x = conv2d_fused(x, params["c1_w"], stride=2, pad=1,
                     bias=params["c1_b"], leaky=True)
    x = conv2d_fused(x, params["c2_w"], stride=2, pad=1,
                     gamma=params["in2_g"], beta=params["in2_b"], leaky=True)
    x = conv2d_fused(x, params["c3_w"], stride=2, pad=1,
                     gamma=params["in3_g"], beta=params["in3_b"], leaky=True)
    x = conv2d_fused(x, params["c4_w"], stride=2, pad=1,
                     gamma=params["in4_g"], beta=params["in4_b"], leaky=True)
    x = conv2d_fused(x, params["c5_w"], stride=2, pad=0,
                     bias=params["c5_b"], leaky=False)
    return x                                               # (bs, 1, 1, 1)


# ---------------------------------------------------------------------------
# Pure-XLA reference (same bf16 matmul inputs / f32 accumulation) for validation
# ---------------------------------------------------------------------------
def _reference_forward(params, img, labels, semantic_latent, image_size):
    bs = img.shape[0]
    H = W = image_size

    def conv(x, w, stride, pad, bias=None):
        y = lax.conv_general_dilated(
            x.astype(jnp.bfloat16), w.astype(jnp.bfloat16),
            (stride, stride), ((pad, pad), (pad, pad)),
            dimension_numbers=("NCHW", "OIHW", "NCHW"),
            preferred_element_type=jnp.float32)
        if bias is not None:
            y = y + bias.reshape(1, -1, 1, 1)
        return y

    def inorm(x, g, b, eps=1e-5):
        mu = jnp.mean(x, axis=(2, 3), keepdims=True)
        var = jnp.mean((x - mu) ** 2, axis=(2, 3), keepdims=True)
        return ((x - mu) * lax.rsqrt(var + eps) * g.reshape(1, -1, 1, 1)
                + b.reshape(1, -1, 1, 1))

    def lrelu(x):
        return jnp.where(x >= 0, x, 0.2 * x)

    feat = jnp.dot(semantic_latent.astype(jnp.bfloat16),
                   params["lin_w"].T.astype(jnp.bfloat16),
                   preferred_element_type=jnp.float32) + params["lin_b"]
    x = jnp.concatenate([img, feat.reshape(bs, 1, H, W),
                         params["emb"][labels].reshape(bs, 1, H, W)], axis=1)
    x = lrelu(conv(x, params["c1_w"], 2, 1, params["c1_b"]))
    x = lrelu(inorm(conv(x, params["c2_w"], 2, 1), params["in2_g"], params["in2_b"]))
    x = lrelu(inorm(conv(x, params["c3_w"], 2, 1), params["in3_g"], params["in3_b"]))
    x = lrelu(inorm(conv(x, params["c4_w"], 2, 1), params["in4_g"], params["in4_b"]))
    x = conv(x, params["c5_w"], 2, 0, params["c5_b"])
    return x


if __name__ == "__main__":
    # Small config (image_size must be 64 for the 5-layer stride-2 stack -> 1x1).
    batch = 2
    num_classes = 5
    image_size = 64
    latent_size = 32
    img_channel = 3
    dis_dim = 8

    key = jax.random.PRNGKey(0)
    k_p, k_img, k_lab, k_z = jax.random.split(key, 4)

    params = init_params(k_p, num_classes, image_size, latent_size, img_channel, dis_dim)
    img = jax.random.normal(k_img, (batch, img_channel, image_size, image_size), jnp.float32)
    labels = jax.random.randint(k_lab, (batch,), 0, num_classes)
    semantic_latent = jax.random.normal(k_z, (batch, latent_size), jnp.float32)

    fwd = jax.jit(functools.partial(discriminator1block_forward, image_size=image_size))
    out = jax.block_until_ready(fwd(params, img, labels, semantic_latent))
    assert out.shape == (batch, 1, 1, 1), out.shape
    assert bool(jnp.all(jnp.isfinite(out)))

    # Validate against the pure-XLA reference (same quantization points).
    ref = jax.block_until_ready(
        jax.jit(functools.partial(_reference_forward, image_size=image_size))(
            params, img, labels, semantic_latent))
    assert jnp.allclose(out, ref.reshape(out.shape), rtol=2e-2, atol=2e-2)

    print("KERNEL_OK")
</pallas_src>

<mosaic_0001>
module attributes {stable_mosaic.version = 11 : i64} {
  func.func @_linear_kernel(%arg0: i32, %arg1: memref<2x32xbf16, #tpu.memory_space<vmem>>, %arg2: memref<32x2048xbf16, #tpu.memory_space<vmem>>, %arg3: memref<1x2048xf32, #tpu.memory_space<vmem>>, %arg4: memref<2x2048xf32, #tpu.memory_space<vmem>>) attributes {dimension_semantics = [#tpu.dimension_semantics<parallel>], iteration_bounds = array<i64: 2>, scalar_prefetch = 0 : i64, scratch_operands = 0 : i64, tpu.core_type = #tpu.core_type<tc>, window_params = [{pipeline_mode = #tpu.pipeline_mode<synchronous>, transform_indices = @transform_0, window_bounds = array<i64: 2, 32>}, {transform_indices = @transform_1, window_bounds = array<i64: 32, 2048>}, {transform_indices = @transform_2, window_bounds = array<i64: 1, 2048>}, {transform_indices = @transform_3, window_bounds = array<i64: 2, 2048>}]} {
    %c0 = arith.constant 0 : index
    %c0_0 = arith.constant 0 : index
    %0 = vector.load %arg1[%c0, %c0_0] : memref<2x32xbf16, #tpu.memory_space<vmem>>, vector<2x32xbf16>
    %c0_1 = arith.constant 0 : index
    %c0_2 = arith.constant 0 : index
    %1 = vector.load %arg2[%c0_1, %c0_2] : memref<32x2048xbf16, #tpu.memory_space<vmem>>, vector<32x2048xbf16>
    %cst = arith.constant dense<0.000000e+00> : vector<2x2048xf32>
    %2 = tpu.matmul %0, %1, %cst {dimension_numbers = #tpu.dot_dimension_numbers<[1], [0], [0], [1], [0, 0, 1, 1], [], []>} : vector<2x32xbf16>, vector<32x2048xbf16>, vector<2x2048xf32> -> vector<2x2048xf32>
    %c0_3 = arith.constant 0 : index
    %c0_4 = arith.constant 0 : index
    %3 = vector.load %arg3[%c0_3, %c0_4] : memref<1x2048xf32, #tpu.memory_space<vmem>>, vector<1x2048xf32>
    %4 = vector.broadcast %3 : vector<1x2048xf32> to vector<2x2048xf32>
    %5 = arith.addf %2, %4 : vector<2x2048xf32>
    %c0_5 = arith.constant 0 : index
    %c0_6 = arith.constant 0 : index
    %6 = vector.load %arg4[%c0_5, %c0_6] : memref<2x2048xf32, #tpu.memory_space<vmem>>, vector<2x2048xf32>
    tpu.vector_store %arg4[%c0_5, %c0_6], %5 {strides = array<i32>} : memref<2x2048xf32, #tpu.memory_space<vmem>>, vector<2x2048xf32>,
    return
  }
  func.func @transform_0(%arg0: i32) -> (i32, i32) {
    %c0_i32 = arith.constant 0 : i32
    %c0_i32_0 = arith.constant 0 : i32
    %c0_i32_1 = arith.constant 0 : i32
    return %c0_i32, %c0_i32_0 : i32, i32
  }
  func.func @transform_1(%arg0: i32) -> (i32, i32) {
    %c0_i32 = arith.constant 0 : i32
    %c0_i32_0 = arith.constant 0 : i32
    return %c0_i32, %arg0 : i32, i32
  }
  func.func @transform_2(%arg0: i32) -> (i32, i32) {
    %c0_i32 = arith.constant 0 : i32
    %c0_i32_0 = arith.constant 0 : i32
    return %c0_i32, %arg0 : i32, i32
  }
  func.func @transform_3(%arg0: i32) -> (i32, i32) {
    %c0_i32 = arith.constant 0 : i32
    %c0_i32_0 = arith.constant 0 : i32
    return %c0_i32, %arg0 : i32, i32
  }
}

module attributes {stable_mosaic.version = 11 : i64} {
  func.func @_conv_fused_kernel(%arg0: i32, %arg1: i32, %arg2: i32, %arg3: memref<1x80x1024xbf16, #tpu.memory_space<vmem>>, %arg4: memref<8x80xbf16, #tpu.memory_space<vmem>>, %arg5: memref<8x1xf32, #tpu.memory_space<vmem>>, %arg6: memref<1x8x1024xf32, #tpu.memory_space<vmem>>, %arg7: memref<8x1024xf32, #tpu.memory_space<vmem>>) attributes {dimension_semantics = [#tpu.dimension_semantics<parallel>, #tpu.dimension_semantics<parallel>, #tpu.dimension_semantics<arbitrary>], iteration_bounds = array<i64: 2, 1, 1>, scalar_prefetch = 0 : i64, scratch_operands = 1 : i64, tpu.core_type = #tpu.core_type<tc>, window_params = [{transform_indices = @transform_0, window_bounds = array<i64: 1, 80, 1024>}, {transform_indices = @transform_1, window_bounds = array<i64: 8, 80>}, {transform_indices = @transform_2, window_bounds = array<i64: 8, 1>}, {transform_indices = @transform_3, window_bounds = array<i64: 1, 8, 1024>}]} {
    %c0_i32 = arith.constant 0 : i32
    %0 = arith.cmpi eq, %arg2, %c0_i32 : i32
    %1 = arith.extui %0 : i1 to i32
    %c0_i32_0 = arith.constant 0 : i32
    %2 = arith.cmpi ne, %1, %c0_i32_0 : i32
    scf.if %2 {
      %cst_11 = arith.constant 0.000000e+00 : f32
      %13 = vector.broadcast %cst_11 : f32 to vector<8x1024xf32>
      %c0_12 = arith.constant 0 : index
      %c0_13 = arith.constant 0 : index
      %14 = vector.load %arg7[%c0_12, %c0_13] : memref<8x1024xf32, #tpu.memory_space<vmem>>, vector<8x1024xf32>
      tpu.vector_store %arg7[%c0_12, %c0_13], %13 {strides = array<i32>} : memref<8x1024xf32, #tpu.memory_space<vmem>>, vector<8x1024xf32>,
    } else {
    }
    %c0 = arith.constant 0 : index
    %c0_1 = arith.constant 0 : index
    %3 = vector.load %arg7[%c0, %c0_1] : memref<8x1024xf32, #tpu.memory_space<vmem>>, vector<8x1024xf32>
    %c0_2 = arith.constant 0 : index
    %c0_3 = arith.constant 0 : index
    %4 = vector.load %arg4[%c0_2, %c0_3] : memref<8x80xbf16, #tpu.memory_space<vmem>>, vector<8x80xbf16>
    %c0_4 = arith.constant 0 : index
    %c0_5 = arith.constant 0 : index
    %c0_6 = arith.constant 0 : index
    %5 = vector.load %arg3[%c0_4, %c0_5, %c0_6] : memref<1x80x1024xbf16, #tpu.memory_space<vmem>>, vector<1x80x1024xbf16>
    %6 = vector.shape_cast %5 : vector<1x80x1024xbf16> to vector<80x1024xbf16>
    %cst = arith.constant dense<0.000000e+00> : vector<8x1024xf32>
    %7 = tpu.matmul %4, %6, %cst {dimension_numbers = #tpu.dot_dimension_numbers<[1], [0], [0], [1], [0, 0, 1, 1], [], []>} : vector<8x80xbf16>, vector<80x1024xbf16>, vector<8x1024xf32> -> vector<8x1024xf32>
    %8 = arith.addf %3, %7 : vector<8x1024xf32>
    %c0_7 = arith.constant 0 : index
    %c0_8 = arith.constant 0 : index
    %9 = vector.load %arg7[%c0_7, %c0_8] : memref<8x1024xf32, #tpu.memory_space<vmem>>, vector<8x1024xf32>
    tpu.vector_store %arg7[%c0_7, %c0_8], %8 {strides = array<i32>} : memref<8x1024xf32, #tpu.memory_space<vmem>>, vector<8x1024xf32>,
    %c0_i32_9 = arith.constant 0 : i32
    %10 = arith.cmpi eq, %arg2, %c0_i32_9 : i32
    %11 = arith.extui %10 : i1 to i32
    %c0_i32_10 = arith.constant 0 : i32
    %12 = arith.cmpi ne, %11, %c0_i32_10 : i32
    scf.if %12 {
      %c0_11 = arith.constant 0 : index
      %c0_12 = arith.constant 0 : index
      %13 = vector.load %arg7[%c0_11, %c0_12] : memref<8x1024xf32, #tpu.memory_space<vmem>>, vector<8x1024xf32>
      %c0_13 = arith.constant 0 : index
      %c0_14 = arith.constant 0 : index
      %14 = vector.load %arg5[%c0_13, %c0_14] : memref<8x1xf32, #tpu.memory_space<vmem>>, vector<8x1xf32>
      %15 = vector.broadcast %14 : vector<8x1xf32> to vector<8x1024xf32>
      %16 = arith.addf %13, %15 : vector<8x1024xf32>
      %cst_15 = arith.constant 0.000000e+00 : f32
      %17 = vector.broadcast %cst_15 : f32 to vector<8x1024xf32>
      %18 = arith.cmpf oge, %16, %17 : vector<8x1024xf32>
      %cst_16 = arith.constant 2.000000e-01 : f32
      %19 = vector.broadcast %cst_16 : f32 to vector<8x1024xf32>
      %20 = arith.mulf %19, %16 : vector<8x1024xf32>
      %21 = arith.select %18, %16, %20 : vector<8x1024xi1>, vector<8x1024xf32>
      %c0_17 = arith.constant 0 : index
      %c0_18 = arith.constant 0 : index
      %c0_19 = arith.constant 0 : index
      %22 = vector.load %arg6[%c0_17, %c0_18, %c0_19] : memref<1x8x1024xf32, #tpu.memory_space<vmem>>, vector<1x8x1024xf32>
      %23 = vector.shape_cast %22 : vector<1x8x1024xf32> to vector<8x1024xf32>
      %24 = vector.shape_cast %21 : vector<8x1024xf32> to vector<1x8x1024xf32>
      tpu.vector_store %arg6[%c0_17, %c0_18, %c0_19], %24 {strides = array<i32>} : memref<1x8x1024xf32, #tpu.memory_space<vmem>>, vector<1x8x1024xf32>,
    } else {
    }
    return
  }
  func.func @transform_0(%arg0: i32, %arg1: i32, %arg2: i32) -> (i32, i32, i32) {
    %c0_i32 = arith.constant 0 : i32
    %c0_i32_0 = arith.constant 0 : i32
    return %arg0, %arg2, %c0_i32 : i32, i32, i32
  }
  func.func @transform_1(%arg0: i32, %arg1: i32, %arg2: i32) -> (i32, i32) {
    %c0_i32 = arith.constant 0 : i32
    return %arg1, %arg2 : i32, i32
  }
  func.func @transform_2(%arg0: i32, %arg1: i32, %arg2: i32) -> (i32, i32) {
    %c0_i32 = arith.constant 0 : i32
    %c0_i32_0 = arith.constant 0 : i32
    return %arg1, %c0_i32 : i32, i32
  }
  func.func @transform_3(%arg0: i32, %arg1: i32, %arg2: i32) -> (i32, i32, i32) {
    %c0_i32 = arith.constant 0 : i32
    %c0_i32_0 = arith.constant 0 : i32
    return %arg0, %arg1, %c0_i32 : i32, i32, i32
  }
}

module attributes {stable_mosaic.version = 11 : i64} {
  func.func @_conv_fused_kernel(%arg0: i32, %arg1: i32, %arg2: i32, %arg3: memref<1x128x256xbf16, #tpu.memory_space<vmem>>, %arg4: memref<8x128xbf16, #tpu.memory_space<vmem>>, %arg5: memref<8x1xf32, #tpu.memory_space<vmem>>, %arg6: memref<8x1xf32, #tpu.memory_space<vmem>>, %arg7: memref<1x8x256xf32, #tpu.memory_space<vmem>>, %arg8: memref<8x256xf32, #tpu.memory_space<vmem>>) attributes {dimension_semantics = [#tpu.dimension_semantics<parallel>, #tpu.dimension_semantics<parallel>, #tpu.dimension_semantics<arbitrary>], iteration_bounds = array<i64: 2, 2, 1>, scalar_prefetch = 0 : i64, scratch_operands = 1 : i64, tpu.core_type = #tpu.core_type<tc>, window_params = [{transform_indices = @transform_0, window_bounds = array<i64: 1, 128, 256>}, {transform_indices = @transform_1, window_bounds = array<i64: 8, 128>}, {transform_indices = @transform_2, window_bounds = array<i64: 8, 1>}, {transform_indices = @transform_3, window_bounds = array<i64: 8, 1>}, {transform_indices = @transform_4, window_bounds = array<i64: 1, 8, 256>}]} {
    %c0_i32 = arith.constant 0 : i32
    %0 = arith.cmpi eq, %arg2, %c0_i32 : i32
    %1 = arith.extui %0 : i1 to i32
    %c0_i32_0 = arith.constant 0 : i32
    %2 = arith.cmpi ne, %1, %c0_i32_0 : i32
    scf.if %2 {
      %cst_11 = arith.constant 0.000000e+00 : f32
      %13 = vector.broadcast %cst_11 : f32 to vector<8x256xf32>
      %c0_12 = arith.constant 0 : index
      %c0_13 = arith.constant 0 : index
      %14 = vector.load %arg8[%c0_12, %c0_13] : memref<8x256xf32, #tpu.memory_space<vmem>>, vector<8x256xf32>
      tpu.vector_store %arg8[%c0_12, %c0_13], %13 {strides = array<i32>} : memref<8x256xf32, #tpu.memory_space<vmem>>, vector<8x256xf32>,
    } else {
    }
    %c0 = arith.constant 0 : index
    %c0_1 = arith.constant 0 : index
    %3 = vector.load %arg8[%c0, %c0_1] : memref<8x256xf32, #tpu.memory_space<vmem>>, vector<8x256xf32>
    %c0_2 = arith.constant 0 : index
    %c0_3 = arith.constant 0 : index
    %4 = vector.load %arg4[%c0_2, %c0_3] : memref<8x128xbf16, #tpu.memory_space<vmem>>, vector<8x128xbf16>
    %c0_4 = arith.constant 0 : index
    %c0_5 = arith.constant 0 : index
    %c0_6 = arith.constant 0 : index
    %5 = vector.load %arg3[%c0_4, %c0_5, %c0_6] : memref<1x128x256xbf16, #tpu.memory_space<vmem>>, vector<1x128x256xbf16>
    %6 = vector.shape_cast %5 : vector<1x128x256xbf16> to vector<128x256xbf16>
    %cst = arith.constant dense<0.000000e+00> : vector<8x256xf32>
    %7 = tpu.matmul %4, %6, %cst {dimension_numbers = #tpu.dot_dimension_numbers<[1], [0], [0], [1], [0, 0, 1, 1], [], []>} : vector<8x128xbf16>, vector<128x256xbf16>, vector<8x256xf32> -> vector<8x256xf32>
    %8 = arith.addf %3, %7 : vector<8x256xf32>
    %c0_7 = arith.constant 0 : index
    %c0_8 = arith.constant 0 : index
    %9 = vector.load %arg8[%c0_7, %c0_8] : memref<8x256xf32, #tpu.memory_space<vmem>>, vector<8x256xf32>
    tpu.vector_store %arg8[%c0_7, %c0_8], %8 {strides = array<i32>} : memref<8x256xf32, #tpu.memory_space<vmem>>, vector<8x256xf32>,
    %c0_i32_9 = arith.constant 0 : i32
    %10 = arith.cmpi eq, %arg2, %c0_i32_9 : i32
    %11 = arith.extui %10 : i1 to i32
    %c0_i32_10 = arith.constant 0 : i32
    %12 = arith.cmpi ne, %11, %c0_i32_10 : i32
    scf.if %12 {
      %c0_11 = arith.constant 0 : index
      %c0_12 = arith.constant 0 : index
      %13 = vector.load %arg8[%c0_11, %c0_12] : memref<8x256xf32, #tpu.memory_space<vmem>>, vector<8x256xf32>
      %cst_13 = arith.constant dense<0.000000e+00> : vector<8xf32>
      %14 = vector.multi_reduction <add>, %13, %cst_13 [1] : vector<8x256xf32> to vector<8xf32>
      %15 = vector.shape_cast %14 : vector<8xf32> to vector<8x1xf32>
      %cst_14 = arith.constant 2.560000e+02 : f32
      %16 = vector.broadcast %cst_14 : f32 to vector<8x1xf32>
      %17 = arith.divf %15, %16 : vector<8x1xf32>
      %18 = vector.broadcast %17 : vector<8x1xf32> to vector<8x256xf32>
      %19 = arith.subf %13, %18 : vector<8x256xf32>
      %20 = arith.mulf %19, %19 : vector<8x256xf32>
      %cst_15 = arith.constant dense<0.000000e+00> : vector<8xf32>
      %21 = vector.multi_reduction <add>, %20, %cst_15 [1] : vector<8x256xf32> to vector<8xf32>
      %22 = vector.shape_cast %21 : vector<8xf32> to vector<8x1xf32>
      %cst_16 = arith.constant 2.560000e+02 : f32
      %23 = vector.broadcast %cst_16 : f32 to vector<8x1xf32>
      %24 = arith.divf %22, %23 : vector<8x1xf32>
      %cst_17 = arith.constant 9.99999974E-6 : f32
      %25 = vector.broadcast %cst_17 : f32 to vector<8x1xf32>
      %26 = arith.addf %24, %25 : vector<8x1xf32>
      %27 = math.rsqrt %26 : vector<8x1xf32>
      %28 = vector.broadcast %27 : vector<8x1xf32> to vector<8x256xf32>
      %29 = arith.mulf %19, %28 : vector<8x256xf32>
      %c0_18 = arith.constant 0 : index
      %c0_19 = arith.constant 0 : index
      %30 = vector.load %arg5[%c0_18, %c0_19] : memref<8x1xf32, #tpu.memory_space<vmem>>, vector<8x1xf32>
      %31 = vector.broadcast %30 : vector<8x1xf32> to vector<8x256xf32>
      %32 = arith.mulf %29, %31 : vector<8x256xf32>
      %c0_20 = arith.constant 0 : index
      %c0_21 = arith.constant 0 : index
      %33 = vector.load %arg6[%c0_20, %c0_21] : memref<8x1xf32, #tpu.memory_space<vmem>>, vector<8x1xf32>
      %34 = vector.broadcast %33 : vector<8x1xf32> to vector<8x256xf32>
      %35 = arith.addf %32, %34 : vector<8x256xf32>
      %cst_22 = arith.constant 0.000000e+00 : f32
      %36 = vector.broadcast %cst_22 : f32 to vector<8x256xf32>
      %37 = arith.cmpf oge, %35, %36 : vector<8x256xf32>
      %cst_23 = arith.constant 2.000000e-01 : f32
      %38 = vector.broadcast %cst_23 : f32 to vector<8x256xf32>
      %39 = arith.mulf %38, %35 : vector<8x256xf32>
      %40 = arith.select %37, %35, %39 : vector<8x256xi1>, vector<8x256xf32>
      %c0_24 = arith.constant 0 : index
      %c0_25 = arith.constant 0 : index
      %c0_26 = arith.constant 0 : index
      %41 = vector.load %arg7[%c0_24, %c0_25, %c0_26] : memref<1x8x256xf32, #tpu.memory_space<vmem>>, vector<1x8x256xf32>
      %42 = vector.shape_cast %41 : vector<1x8x256xf32> to vector<8x256xf32>
      %43 = vector.shape_cast %40 : vector<8x256xf32> to vector<1x8x256xf32>
      tpu.vector_store %arg7[%c0_24, %c0_25, %c0_26], %43 {strides = array<i32>} : memref<1x8x256xf32, #tpu.memory_space<vmem>>, vector<1x8x256xf32>,
    } else {
    }
    return
  }
  func.func @transform_0(%arg0: i32, %arg1: i32, %arg2: i32) -> (i32, i32, i32) {
    %c0_i32 = arith.constant 0 : i32
    %c0_i32_0 = arith.constant 0 : i32
    return %arg0, %arg2, %c0_i32 : i32, i32, i32
  }
  func.func @transform_1(%arg0: i32, %arg1: i32, %arg2: i32) -> (i32, i32) {
    %c0_i32 = arith.constant 0 : i32
    return %arg1, %arg2 : i32, i32
  }
  func.func @transform_2(%arg0: i32, %arg1: i32, %arg2: i32) -> (i32, i32) {
    %c0_i32 = arith.constant 0 : i32
    %c0_i32_0 = arith.constant 0 : i32
    return %arg1, %c0_i32 : i32, i32
  }
  func.func @transform_3(%arg0: i32, %arg1: i32, %arg2: i32) -> (i32, i32) {
    %c0_i32 = arith.constant 0 : i32
    %c0_i32_0 = arith.constant 0 : i32
    return %arg1, %c0_i32 : i32, i32
  }
  func.func @transform_4(%arg0: i32, %arg1: i32, %arg2: i32) -> (i32, i32, i32) {
    %c0_i32 = arith.constant 0 : i32
    %c0_i32_0 = arith.constant 0 : i32
    return %arg0, %arg1, %c0_i32 : i32, i32, i32
  }
}

module attributes {stable_mosaic.version = 11 : i64} {
  func.func @_conv_fused_kernel(%arg0: i32, %arg1: i32, %arg2: i32, %arg3: memref<1x256x64xbf16, #tpu.memory_space<vmem>>, %arg4: memref<16x256xbf16, #tpu.memory_space<vmem>>, %arg5: memref<16x1xf32, #tpu.memory_space<vmem>>, %arg6: memref<16x1xf32, #tpu.memory_space<vmem>>, %arg7: memref<1x16x64xf32, #tpu.memory_space<vmem>>, %arg8: memref<16x64xf32, #tpu.memory_space<vmem>>) attributes {dimension_semantics = [#tpu.dimension_semantics<parallel>, #tpu.dimension_semantics<parallel>, #tpu.dimension_semantics<arbitrary>], iteration_bounds = array<i64: 2, 2, 1>, scalar_prefetch = 0 : i64, scratch_operands = 1 : i64, tpu.core_type = #tpu.core_type<tc>, window_params = [{transform_indices = @transform_0, window_bounds = array<i64: 1, 256, 64>}, {transform_indices = @transform_1, window_bounds = array<i64: 16, 256>}, {transform_indices = @transform_2, window_bounds = array<i64: 16, 1>}, {transform_indices = @transform_3, window_bounds = array<i64: 16, 1>}, {transform_indices = @transform_4, window_bounds = array<i64: 1, 16, 64>}]} {
    %c0_i32 = arith.constant 0 : i32
    %0 = arith.cmpi eq, %arg2, %c0_i32 : i32
    %1 = arith.extui %0 : i1 to i32
    %c0_i32_0 = arith.constant 0 : i32
    %2 = arith.cmpi ne, %1, %c0_i32_0 : i32
    scf.if %2 {
      %cst_11 = arith.constant 0.000000e+00 : f32
      %13 = vector.broadcast %cst_11 : f32 to vector<16x64xf32>
      %c0_12 = arith.constant 0 : index
      %c0_13 = arith.constant 0 : index
      %14 = vector.load %arg8[%c0_12, %c0_13] : memref<16x64xf32, #tpu.memory_space<vmem>>, vector<16x64xf32>
      tpu.vector_store %arg8[%c0_12, %c0_13], %13 {strides = array<i32>} : memref<16x64xf32, #tpu.memory_space<vmem>>, vector<16x64xf32>,
    } else {
    }
    %c0 = arith.constant 0 : index
    %c0_1 = arith.constant 0 : index
    %3 = vector.load %arg8[%c0, %c0_1] : memref<16x64xf32, #tpu.memory_space<vmem>>, vector<16x64xf32>
    %c0_2 = arith.constant 0 : index
    %c0_3 = arith.constant 0 : index
    %4 = vector.load %arg4[%c0_2, %c0_3] : memref<16x256xbf16, #tpu.memory_space<vmem>>, vector<16x256xbf16>
    %c0_4 = arith.constant 0 : index
    %c0_5 = arith.constant 0 : index
    %c0_6 = arith.constant 0 : index
    %5 = vector.load %arg3[%c0_4, %c0_5, %c0_6] : memref<1x256x64xbf16, #tpu.memory_space<vmem>>, vector<1x256x64xbf16>
    %6 = vector.shape_cast %5 : vector<1x256x64xbf16> to vector<256x64xbf16>
    %cst = arith.constant dense<0.000000e+00> : vector<16x64xf32>
    %7 = tpu.matmul %4, %6, %cst {dimension_numbers = #tpu.dot_dimension_numbers<[1], [0], [0], [1], [0, 0, 1, 1], [], []>} : vector<16x256xbf16>, vector<256x64xbf16>, vector<16x64xf32> -> vector<16x64xf32>
    %8 = arith.addf %3, %7 : vector<16x64xf32>
    %c0_7 = arith.constant 0 : index
    %c0_8 = arith.constant 0 : index
    %9 = vector.load %arg8[%c0_7, %c0_8] : memref<16x64xf32, #tpu.memory_space<vmem>>, vector<16x64xf32>
    tpu.vector_store %arg8[%c0_7, %c0_8], %8 {strides = array<i32>} : memref<16x64xf32, #tpu.memory_space<vmem>>, vector<16x64xf32>,
    %c0_i32_9 = arith.constant 0 : i32
    %10 = arith.cmpi eq, %arg2, %c0_i32_9 : i32
    %11 = arith.extui %10 : i1 to i32
    %c0_i32_10 = arith.constant 0 : i32
    %12 = arith.cmpi ne, %11, %c0_i32_10 : i32
    scf.if %12 {
      %c0_11 = arith.constant 0 : index
      %c0_12 = arith.constant 0 : index
      %13 = vector.load %arg8[%c0_11, %c0_12] : memref<16x64xf32, #tpu.memory_space<vmem>>, vector<16x64xf32>
      %cst_13 = arith.constant dense<0.000000e+00> : vector<16xf32>
      %14 = vector.multi_reduction <add>, %13, %cst_13 [1] : vector<16x64xf32> to vector<16xf32>
      %15 = vector.shape_cast %14 : vector<16xf32> to vector<16x1xf32>
      %cst_14 = arith.constant 6.400000e+01 : f32
      %16 = vector.broadcast %cst_14 : f32 to vector<16x1xf32>
      %17 = arith.divf %15, %16 : vector<16x1xf32>
      %18 = vector.broadcast %17 : vector<16x1xf32> to vector<16x64xf32>
      %19 = arith.subf %13, %18 : vector<16x64xf32>
      %20 = arith.mulf %19, %19 : vector<16x64xf32>
      %cst_15 = arith.constant dense<0.000000e+00> : vector<16xf32>
      %21 = vector.multi_reduction <add>, %20, %cst_15 [1] : vector<16x64xf32> to vector<16xf32>
      %22 = vector.shape_cast %21 : vector<16xf32> to vector<16x1xf32>
      %cst_16 = arith.constant 6.400000e+01 : f32
      %23 = vector.broadcast %cst_16 : f32 to vector<16x1xf32>
      %24 = arith.divf %22, %23 : vector<16x1xf32>
      %cst_17 = arith.constant 9.99999974E-6 : f32
      %25 = vector.broadcast %cst_17 : f32 to vector<16x1xf32>
      %26 = arith.addf %24, %25 : vector<16x1xf32>
      %27 = math.rsqrt %26 : vector<16x1xf32>
      %28 = vector.broadcast %27 : vector<16x1xf32> to vector<16x64xf32>
      %29 = arith.mulf %19, %28 : vector<16x64xf32>
      %c0_18 = arith.constant 0 : index
      %c0_19 = arith.constant 0 : index
      %30 = vector.load %arg5[%c0_18, %c0_19] : memref<16x1xf32, #tpu.memory_space<vmem>>, vector<16x1xf32>
      %31 = vector.broadcast %30 : vector<16x1xf32> to vector<16x64xf32>
      %32 = arith.mulf %29, %31 : vector<16x64xf32>
      %c0_20 = arith.constant 0 : index
      %c0_21 = arith.constant 0 : index
      %33 = vector.load %arg6[%c0_20, %c0_21] : memref<16x1xf32, #tpu.memory_space<vmem>>, vector<16x1xf32>
      %34 = vector.broadcast %33 : vector<16x1xf32> to vector<16x64xf32>
      %35 = arith.addf %32, %34 : vector<16x64xf32>
      %cst_22 = arith.constant 0.000000e+00 : f32
      %36 = vector.broadcast %cst_22 : f32 to vector<16x64xf32>
      %37 = arith.cmpf oge, %35, %36 : vector<16x64xf32>
      %cst_23 = arith.constant 2.000000e-01 : f32
      %38 = vector.broadcast %cst_23 : f32 to vector<16x64xf32>
      %39 = arith.mulf %38, %35 : vector<16x64xf32>
      %40 = arith.select %37, %35, %39 : vector<16x64xi1>, vector<16x64xf32>
      %c0_24 = arith.constant 0 : index
      %c0_25 = arith.constant 0 : index
      %c0_26 = arith.constant 0 : index
      %41 = vector.load %arg7[%c0_24, %c0_25, %c0_26] : memref<1x16x64xf32, #tpu.memory_space<vmem>>, vector<1x16x64xf32>
      %42 = vector.shape_cast %41 : vector<1x16x64xf32> to vector<16x64xf32>
      %43 = vector.shape_cast %40 : vector<16x64xf32> to vector<1x16x64xf32>
      tpu.vector_store %arg7[%c0_24, %c0_25, %c0_26], %43 {strides = array<i32>} : memref<1x16x64xf32, #tpu.memory_space<vmem>>, vector<1x16x64xf32>,
    } else {
    }
    return
  }
  func.func @transform_0(%arg0: i32, %arg1: i32, %arg2: i32) -> (i32, i32, i32) {
    %c0_i32 = arith.constant 0 : i32
    %c0_i32_0 = arith.constant 0 : i32
    return %arg0, %arg2, %c0_i32 : i32, i32, i32
  }
  func.func @transform_1(%arg0: i32, %arg1: i32, %arg2: i32) -> (i32, i32) {
    %c0_i32 = arith.constant 0 : i32
    return %arg1, %arg2 : i32, i32
  }
  func.func @transform_2(%arg0: i32, %arg1: i32, %arg2: i32) -> (i32, i32) {
    %c0_i32 = arith.constant 0 : i32
    %c0_i32_0 = arith.constant 0 : i32
    return %arg1, %c0_i32 : i32, i32
  }
  func.func @transform_3(%arg0: i32, %arg1: i32, %arg2: i32) -> (i32, i32) {
    %c0_i32 = arith.constant 0 : i32
    %c0_i32_0 = arith.constant 0 : i32
    return %arg1, %c0_i32 : i32, i32
  }
  func.func @transform_4(%arg0: i32, %arg1: i32, %arg2: i32) -> (i32, i32, i32) {
    %c0_i32 = arith.constant 0 : i32
    %c0_i32_0 = arith.constant 0 : i32
    return %arg0, %arg1, %c0_i32 : i32, i32, i32
  }
}

module attributes {stable_mosaic.version = 11 : i64} {
  func.func @_conv_fused_kernel(%arg0: i32, %arg1: i32, %arg2: i32, %arg3: memref<1x512x16xbf16, #tpu.memory_space<vmem>>, %arg4: memref<32x512xbf16, #tpu.memory_space<vmem>>, %arg5: memref<32x1xf32, #tpu.memory_space<vmem>>, %arg6: memref<32x1xf32, #tpu.memory_space<vmem>>, %arg7: memref<1x32x16xf32, #tpu.memory_space<vmem>>, %arg8: memref<32x16xf32, #tpu.memory_space<vmem>>) attributes {dimension_semantics = [#tpu.dimension_semantics<parallel>, #tpu.dimension_semantics<parallel>, #tpu.dimension_semantics<arbitrary>], iteration_bounds = array<i64: 2, 2, 1>, scalar_prefetch = 0 : i64, scratch_operands = 1 : i64, tpu.core_type = #tpu.core_type<tc>, window_params = [{transform_indices = @transform_0, window_bounds = array<i64: 1, 512, 16>}, {transform_indices = @transform_1, window_bounds = array<i64: 32, 512>}, {transform_indices = @transform_2, window_bounds = array<i64: 32, 1>}, {transform_indices = @transform_3, window_bounds = array<i64: 32, 1>}, {transform_indices = @transform_4, window_bounds = array<i64: 1, 32, 16>}]} {
    %c0_i32 = arith.constant 0 : i32
    %0 = arith.cmpi eq, %arg2, %c0_i32 : i32
    %1 = arith.extui %0 : i1 to i32
    %c0_i32_0 = arith.constant 0 : i32
    %2 = arith.cmpi ne, %1, %c0_i32_0 : i32
    scf.if %2 {
      %cst_11 = arith.constant 0.000000e+00 : f32
      %13 = vector.broadcast %cst_11 : f32 to vector<32x16xf32>
      %c0_12 = arith.constant 0 : index
      %c0_13 = arith.constant 0 : index
      %14 = vector.load %arg8[%c0_12, %c0_13] : memref<32x16xf32, #tpu.memory_space<vmem>>, vector<32x16xf32>
      tpu.vector_store %arg8[%c0_12, %c0_13], %13 {strides = array<i32>} : memref<32x16xf32, #tpu.memory_space<vmem>>, vector<32x16xf32>,
    } else {
    }
    %c0 = arith.constant 0 : index
    %c0_1 = arith.constant 0 : index
    %3 = vector.load %arg8[%c0, %c0_1] : memref<32x16xf32, #tpu.memory_space<vmem>>, vector<32x16xf32>
    %c0_2 = arith.constant 0 : index
    %c0_3 = arith.constant 0 : index
    %4 = vector.load %arg4[%c0_2, %c0_3] : memref<32x512xbf16, #tpu.memory_space<vmem>>, vector<32x512xbf16>
    %c0_4 = arith.constant 0 : index
    %c0_5 = arith.constant 0 : index
    %c0_6 = arith.constant 0 : index
    %5 = vector.load %arg3[%c0_4, %c0_5, %c0_6] : memref<1x512x16xbf16, #tpu.memory_space<vmem>>, vector<1x512x16xbf16>
    %6 = vector.shape_cast %5 : vector<1x512x16xbf16> to vector<512x16xbf16>
    %cst = arith.constant dense<0.000000e+00> : vector<32x16xf32>
    %7 = tpu.matmul %4, %6, %cst {dimension_numbers = #tpu.dot_dimension_numbers<[1], [0], [0], [1], [0, 0, 1, 1], [], []>} : vector<32x512xbf16>, vector<512x16xbf16>, vector<32x16xf32> -> vector<32x16xf32>
    %8 = arith.addf %3, %7 : vector<32x16xf32>
    %c0_7 = arith.constant 0 : index
    %c0_8 = arith.constant 0 : index
    %9 = vector.load %arg8[%c0_7, %c0_8] : memref<32x16xf32, #tpu.memory_space<vmem>>, vector<32x16xf32>
    tpu.vector_store %arg8[%c0_7, %c0_8], %8 {strides = array<i32>} : memref<32x16xf32, #tpu.memory_space<vmem>>, vector<32x16xf32>,
    %c0_i32_9 = arith.constant 0 : i32
    %10 = arith.cmpi eq, %arg2, %c0_i32_9 : i32
    %11 = arith.extui %10 : i1 to i32
    %c0_i32_10 = arith.constant 0 : i32
    %12 = arith.cmpi ne, %11, %c0_i32_10 : i32
    scf.if %12 {
      %c0_11 = arith.constant 0 : index
      %c0_12 = arith.constant 0 : index
      %13 = vector.load %arg8[%c0_11, %c0_12] : memref<32x16xf32, #tpu.memory_space<vmem>>, vector<32x16xf32>
      %cst_13 = arith.constant dense<0.000000e+00> : vector<32xf32>
      %14 = vector.multi_reduction <add>, %13, %cst_13 [1] : vector<32x16xf32> to vector<32xf32>
      %15 = vector.shape_cast %14 : vector<32xf32> to vector<32x1xf32>
      %cst_14 = arith.constant 1.600000e+01 : f32
      %16 = vector.broadcast %cst_14 : f32 to vector<32x1xf32>
      %17 = arith.divf %15, %16 : vector<32x1xf32>
      %18 = vector.broadcast %17 : vector<32x1xf32> to vector<32x16xf32>
      %19 = arith.subf %13, %18 : vector<32x16xf32>
      %20 = arith.mulf %19, %19 : vector<32x16xf32>
      %cst_15 = arith.constant dense<0.000000e+00> : vector<32xf32>
      %21 = vector.multi_reduction <add>, %20, %cst_15 [1] : vector<32x16xf32> to vector<32xf32>
      %22 = vector.shape_cast %21 : vector<32xf32> to vector<32x1xf32>
      %cst_16 = arith.constant 1.600000e+01 : f32
      %23 = vector.broadcast %cst_16 : f32 to vector<32x1xf32>
      %24 = arith.divf %22, %23 : vector<32x1xf32>
      %cst_17 = arith.constant 9.99999974E-6 : f32
      %25 = vector.broadcast %cst_17 : f32 to vector<32x1xf32>
      %26 = arith.addf %24, %25 : vector<32x1xf32>
      %27 = math.rsqrt %26 : vector<32x1xf32>
      %28 = vector.broadcast %27 : vector<32x1xf32> to vector<32x16xf32>
      %29 = arith.mulf %19, %28 : vector<32x16xf32>
      %c0_18 = arith.constant 0 : index
      %c0_19 = arith.constant 0 : index
      %30 = vector.load %arg5[%c0_18, %c0_19] : memref<32x1xf32, #tpu.memory_space<vmem>>, vector<32x1xf32>
      %31 = vector.broadcast %30 : vector<32x1xf32> to vector<32x16xf32>
      %32 = arith.mulf %29, %31 : vector<32x16xf32>
      %c0_20 = arith.constant 0 : index
      %c0_21 = arith.constant 0 : index
      %33 = vector.load %arg6[%c0_20, %c0_21] : memref<32x1xf32, #tpu.memory_space<vmem>>, vector<32x1xf32>
      %34 = vector.broadcast %33 : vector<32x1xf32> to vector<32x16xf32>
      %35 = arith.addf %32, %34 : vector<32x16xf32>
      %cst_22 = arith.constant 0.000000e+00 : f32
      %36 = vector.broadcast %cst_22 : f32 to vector<32x16xf32>
      %37 = arith.cmpf oge, %35, %36 : vector<32x16xf32>
      %cst_23 = arith.constant 2.000000e-01 : f32
      %38 = vector.broadcast %cst_23 : f32 to vector<32x16xf32>
      %39 = arith.mulf %38, %35 : vector<32x16xf32>
      %40 = arith.select %37, %35, %39 : vector<32x16xi1>, vector<32x16xf32>
      %c0_24 = arith.constant 0 : index
      %c0_25 = arith.constant 0 : index
      %c0_26 = arith.constant 0 : index
      %41 = vector.load %arg7[%c0_24, %c0_25, %c0_26] : memref<1x32x16xf32, #tpu.memory_space<vmem>>, vector<1x32x16xf32>
      %42 = vector.shape_cast %41 : vector<1x32x16xf32> to vector<32x16xf32>
      %43 = vector.shape_cast %40 : vector<32x16xf32> to vector<1x32x16xf32>
      tpu.vector_store %arg7[%c0_24, %c0_25, %c0_26], %43 {strides = array<i32>} : memref<1x32x16xf32, #tpu.memory_space<vmem>>, vector<1x32x16xf32>,
    } else {
    }
    return
  }
  func.func @transform_0(%arg0: i32, %arg1: i32, %arg2: i32) -> (i32, i32, i32) {
    %c0_i32 = arith.constant 0 : i32
    %c0_i32_0 = arith.constant 0 : i32
    return %arg0, %arg2, %c0_i32 : i32, i32, i32
  }
  func.func @transform_1(%arg0: i32, %arg1: i32, %arg2: i32) -> (i32, i32) {
    %c0_i32 = arith.constant 0 : i32
    return %arg1, %arg2 : i32, i32
  }
  func.func @transform_2(%arg0: i32, %arg1: i32, %arg2: i32) -> (i32, i32) {
    %c0_i32 = arith.constant 0 : i32
    %c0_i32_0 = arith.constant 0 : i32
    return %arg1, %c0_i32 : i32, i32
  }
  func.func @transform_3(%arg0: i32, %arg1: i32, %arg2: i32) -> (i32, i32) {
    %c0_i32 = arith.constant 0 : i32
    %c0_i32_0 = arith.constant 0 : i32
    return %arg1, %c0_i32 : i32, i32
  }
  func.func @transform_4(%arg0: i32, %arg1: i32, %arg2: i32) -> (i32, i32, i32) {
    %c0_i32 = arith.constant 0 : i32
    %c0_i32_0 = arith.constant 0 : i32
    return %arg0, %arg1, %c0_i32 : i32, i32, i32
  }
}

module attributes {stable_mosaic.version = 11 : i64} {
  func.func @_conv_fused_kernel(%arg0: i32, %arg1: i32, %arg2: i32, %arg3: memref<1x512x1xbf16, #tpu.memory_space<vmem>>, %arg4: memref<1x512xbf16, #tpu.memory_space<vmem>>, %arg5: memref<1x1xf32, #tpu.memory_space<vmem>>, %arg6: memref<1x1x1xf32, #tpu.memory_space<vmem>>, %arg7: memref<1x1xf32, #tpu.memory_space<vmem>>) attributes {dimension_semantics = [#tpu.dimension_semantics<parallel>, #tpu.dimension_semantics<parallel>, #tpu.dimension_semantics<arbitrary>], iteration_bounds = array<i64: 2, 1, 2>, scalar_prefetch = 0 : i64, scratch_operands = 1 : i64, tpu.core_type = #tpu.core_type<tc>, window_params = [{transform_indices = @transform_0, window_bounds = array<i64: 1, 512, 1>}, {transform_indices = @transform_1, window_bounds = array<i64: 1, 512>}, {transform_indices = @transform_2, window_bounds = array<i64: 1, 1>}, {transform_indices = @transform_3, window_bounds = array<i64: 1, 1, 1>}]} {
    %c0_i32 = arith.constant 0 : i32
    %0 = arith.cmpi eq, %arg2, %c0_i32 : i32
    %1 = arith.extui %0 : i1 to i32
    %c0_i32_0 = arith.constant 0 : i32
    %2 = arith.cmpi ne, %1, %c0_i32_0 : i32
    scf.if %2 {
      %cst_10 = arith.constant 0.000000e+00 : f32
      %13 = vector.broadcast %cst_10 : f32 to vector<1x1xf32>
      %c0_11 = arith.constant 0 : index
      %c0_12 = arith.constant 0 : index
      %14 = vector.load %arg7[%c0_11, %c0_12] : memref<1x1xf32, #tpu.memory_space<vmem>>, vector<1x1xf32>
      tpu.vector_store %arg7[%c0_11, %c0_12], %13 {strides = array<i32>} : memref<1x1xf32, #tpu.memory_space<vmem>>, vector<1x1xf32>,
    } else {
    }
    %c0 = arith.constant 0 : index
    %c0_1 = arith.constant 0 : index
    %3 = vector.load %arg7[%c0, %c0_1] : memref<1x1xf32, #tpu.memory_space<vmem>>, vector<1x1xf32>
    %c0_2 = arith.constant 0 : index
    %c0_3 = arith.constant 0 : index
    %4 = vector.load %arg4[%c0_2, %c0_3] : memref<1x512xbf16, #tpu.memory_space<vmem>>, vector<1x512xbf16>
    %c0_4 = arith.constant 0 : index
    %c0_5 = arith.constant 0 : index
    %c0_6 = arith.constant 0 : index
    %5 = vector.load %arg3[%c0_4, %c0_5, %c0_6] : memref<1x512x1xbf16, #tpu.memory_space<vmem>>, vector<1x512x1xbf16>
    %6 = vector.shape_cast %5 : vector<1x512x1xbf16> to vector<512x1xbf16>
    %cst = arith.constant dense<0.000000e+00> : vector<1x1xf32>
    %7 = tpu.matmul %4, %6, %cst {dimension_numbers = #tpu.dot_dimension_numbers<[1], [0], [0], [1], [0, 0, 1, 1], [], []>} : vector<1x512xbf16>, vector<512x1xbf16>, vector<1x1xf32> -> vector<1x1xf32>
    %8 = arith.addf %3, %7 : vector<1x1xf32>
    %c0_7 = arith.constant 0 : index
    %c0_8 = arith.constant 0 : index
    %9 = vector.load %arg7[%c0_7, %c0_8] : memref<1x1xf32, #tpu.memory_space<vmem>>, vector<1x1xf32>
    tpu.vector_store %arg7[%c0_7, %c0_8], %8 {strides = array<i32>} : memref<1x1xf32, #tpu.memory_space<vmem>>, vector<1x1xf32>,
    %c1_i32 = arith.constant 1 : i32
    %10 = arith.cmpi eq, %arg2, %c1_i32 : i32
    %11 = arith.extui %10 : i1 to i32
    %c0_i32_9 = arith.constant 0 : i32
    %12 = arith.cmpi ne, %11, %c0_i32_9 : i32
    scf.if %12 {
      %c0_10 = arith.constant 0 : index
      %c0_11 = arith.constant 0 : index
      %13 = vector.load %arg7[%c0_10, %c0_11] : memref<1x1xf32, #tpu.memory_space<vmem>>, vector<1x1xf32>
      %c0_12 = arith.constant 0 : index
      %c0_13 = arith.constant 0 : index
      %14 = vector.load %arg5[%c0_12, %c0_13] : memref<1x1xf32, #tpu.memory_space<vmem>>, vector<1x1xf32>
      %15 = arith.addf %13, %14 : vector<1x1xf32>
      %c0_14 = arith.constant 0 : index
      %c0_15 = arith.constant 0 : index
      %c0_16 = arith.constant 0 : index
      %16 = vector.load %arg6[%c0_14, %c0_15, %c0_16] : memref<1x1x1xf32, #tpu.memory_space<vmem>>, vector<1x1x1xf32>
      %17 = vector.shape_cast %16 : vector<1x1x1xf32> to vector<1x1xf32>
      %18 = vector.shape_cast %15 : vector<1x1xf32> to vector<1x1x1xf32>
      tpu.vector_store %arg6[%c0_14, %c0_15, %c0_16], %18 {strides = array<i32>} : memref<1x1x1xf32, #tpu.memory_space<vmem>>, vector<1x1x1xf32>,
    } else {
    }
    return
  }
  func.func @transform_0(%arg0: i32, %arg1: i32, %arg2: i32) -> (i32, i32, i32) {
    %c0_i32 = arith.constant 0 : i32
    %c0_i32_0 = arith.constant 0 : i32
    return %arg0, %arg2, %c0_i32 : i32, i32, i32
  }
  func.func @transform_1(%arg0: i32, %arg1: i32, %arg2: i32) -> (i32, i32) {
    %c0_i32 = arith.constant 0 : i32
    return %arg1, %arg2 : i32, i32
  }
  func.func @transform_2(%arg0: i32, %arg1: i32, %arg2: i32) -> (i32, i32) {
    %c0_i32 = arith.constant 0 : i32
    %c0_i32_0 = arith.constant 0 : i32
    return %arg1, %c0_i32 : i32, i32
  }
  func.func @transform_3(%arg0: i32, %arg1: i32, %arg2: i32) -> (i32, i32, i32) {
    %c0_i32 = arith.constant 0 : i32
    %c0_i32_0 = arith.constant 0 : i32
    return %arg0, %arg1, %c0_i32 : i32, i32, i32
  }
}

</mosaic_0001>

<bundles_post_ra>
// kernel: discriminator1block_forward.6
= control target key start
LH: loop header
LB: loop body
LE: loop exit
PB: predicated region body
PF: predicated region fallthrough
CT: control target
= control target key end

     0   :  { %8 = vsyncpa [#allocation4], 0  ;;  %s1524_s0 = inlined_call_operand.vmem [shape: bf16[2,32], index: 0, kind: input, shape index: {}]   ;;  %s1525_s1 = inlined_call_operand.vmem [shape: bf16[32,4096], index: 1, kind: input, shape index: {}]   ;;  %s1526_s2 = inlined_call_operand.hbm [shape: f32[1,4096], index: 2, kind: input, shape index: {}]   ;;  %s1527_s3 = inlined_call_operand.vmem [shape: f32[2,4096], index: 3, kind: output, shape index: {}]  }
   0x1   :  { %10 = vsyncpa [#allocation4 + $0x1], 0  ;;  %s1263_s12 = smov 0   ;;  %s1265_s13 = smov 0  }
   0x2   :  { %s1267_s14 = smov 0   ;;  %s1269_s15 = smov 0  }
   0x3 LB: > { %s1081_s16 = sadd.s32 4294967295, %s1238_s15   ;;  %s1283_s17 = sadd.s32 1, %s1238_s15   ;;  %s1238_s15 = sphi %s1269_s15, %s1535_s15   ;;  %s1234_s14 = sphi %s1267_s14, %s1534_s14   ;;  %s1230_s13 = sphi %s1265_s13, %s1533_s13   ;;  %s1226_s12 = sphi %s1263_s12, %s1532_s12  }
   0x4   : > { %s41_s18 = ssub.s32 %s1238_s15, %s1283_s17  ;;  %s44_s19 = sadd.s32 1, %s1234_s14 }
   0x5   : > { %p42_p0 = scmp.eq.s32.totalorder %s41_s18, 0  ;;  %p51_p1 = scmp.ne.s32.totalorder %s1234_s14, %s1230_s13 }
   0x6   : > { %p52_p2 = scmp.eq.s32.totalorder %s1238_s15, 0  ;;  %p83_p3 = scmp.ne.s32.totalorder %s1230_s13, %s1226_s12 }
   0x7   : > { %s1293_s20 = scalar_select %p42_p0, %s1234_s14, %s44_s19  }
   0x8   : > { %p1295_p4 = por %p52_p2, %p51_p1  ;;  %p84_p5 = scmp.eq.s32.totalorder %s1081_s16, 0 }
   0x9   : > { %p1084_p7 = scmp.ge.s32.totalorder %s1238_s15, 2 }
   0xa   : > { %p1301_p6 = por %p84_p5, %p83_p3 }
   0xb   : > { %132 = sbr.rel (%p1084_p7) target bundleno = 63 (0x3f), region = 20 }
   0xc   : > { %s1530_s22 = scalar_select %p1301_p6, 1, 0 }
  0x12   : > { %135 = sbr.rel (!%p1295_p4) target bundleno = 38 (0x26), region = 24  ;;  %s137_s23 = sand.u32 (%p1295_p4), 1, %s1234_s14  }
  0x13   : > { %s1138_s24 = sshll.u32 (%p1295_p4), %s1238_s15, 6  ;;  %s1085_s25 = sshll.u32 (%p1295_p4), %s137_s23, 8 }
  0x14   : > { %s1313_s28 = scalar_lea.vmem (%p1295_p4), %s1525_s1, %s1138_s24  ;;  %s1318_s29 = scalar_lea.vmem (%p1295_p4), [#allocation2], %s1085_s25 }
  0x15   : > { %v155_v0 = vld [vmem:[%s1313_s28] sm:$0xff] (%p1295_p4)  ;;  %v157_v1 = vld [vmem:[%s1313_s28 + $0x8] sm:$0xff] (%p1295_p4)  ;;  %v159_v2 = vld [vmem:[%s1313_s28 + $0x10] sm:$0xff] (%p1295_p4) }
  0x16   : > { %156 = vst [vmem:[%s1318_s29] sm:$0xff] (%p1295_p4), %v155_v0  ;;  %158 = vst [vmem:[%s1318_s29 + $0x8] sm:$0xff] (%p1295_p4), %v157_v1  ;;  %v161_v3 = vld [vmem:[%s1313_s28 + $0x18] sm:$0xff] (%p1295_p4)  ;;  %v163_v4 = vld [vmem:[%s1313_s28 + $0x20] sm:$0xff] (%p1295_p4) }
  0x17   : > { %160 = vst [vmem:[%s1318_s29 + $0x10] sm:$0xff] (%p1295_p4), %v159_v2  ;;  %v165_v5 = vld [vmem:[%s1313_s28 + $0x28] sm:$0xff] (%p1295_p4)  ;;  %162 = vst [vmem:[%s1318_s29 + $0x18] sm:$0xff] (%p1295_p4), %v161_v3  ;;  %v167_v6 = vld [vmem:[%s1313_s28 + $0x30] sm:$0xff] (%p1295_p4) }
  0x18   : > { %164 = vst [vmem:[%s1318_s29 + $0x20] sm:$0xff] (%p1295_p4), %v163_v4  ;;  %166 = vst [vmem:[%s1318_s29 + $0x28] sm:$0xff] (%p1295_p4), %v165_v5  ;;  %v169_v7 = vld [vmem:[%s1313_s28 + $0x38] sm:$0xff] (%p1295_p4)  ;;  %v171_v8 = vld [vmem:[%s1313_s28 + $0x80] sm:$0xff] (%p1295_p4) }
  0x19   : > { %168 = vst [vmem:[%s1318_s29 + $0x30] sm:$0xff] %v167_v6  ;;  %170 = vst [vmem:[%s1318_s29 + $0x38] sm:$0xff] %v169_v7  ;;  %v173_v9 = vld [vmem:[%s1313_s28 + $0x88] sm:$0xff]  ;;  %v175_v10 = vld [vmem:[%s1313_s28 + $0x90] sm:$0xff] }
  0x1a   : > { %172 = vst [vmem:[%s1318_s29 + $0x40] sm:$0xff] %v171_v8  ;;  %v177_v11 = vld [vmem:[%s1313_s28 + $0x98] sm:$0xff]  ;;  %174 = vst [vmem:[%s1318_s29 + $0x48] sm:$0xff] %v173_v9  ;;  %v179_v12 = vld [vmem:[%s1313_s28 + $0xa0] sm:$0xff] }
  0x1b   : > { %176 = vst [vmem:[%s1318_s29 + $0x50] sm:$0xff] %v175_v10  ;;  %178 = vst [vmem:[%s1318_s29 + $0x58] sm:$0xff] %v177_v11  ;;  %v181_v13 = vld [vmem:[%s1313_s28 + $0xa8] sm:$0xff]  ;;  %v183_v14 = vld [vmem:[%s1313_s28 + $0xb0] sm:$0xff] }
  0x1c   : > { %180 = vst [vmem:[%s1318_s29 + $0x60] sm:$0xff] %v179_v12  ;;  %182 = vst [vmem:[%s1318_s29 + $0x68] sm:$0xff] %v181_v13  ;;  %v185_v15 = vld [vmem:[%s1313_s28 + $0xb8] sm:$0xff]  ;;  %v187_v16 = vld [vmem:[%s1313_s28 + $0x100] sm:$0xff] }
  0x1d   : > { %184 = vst [vmem:[%s1318_s29 + $0x70] sm:$0xff] %v183_v14  ;;  %v189_v17 = vld [vmem:[%s1313_s28 + $0x108] sm:$0xff]  ;;  %186 = vst [vmem:[%s1318_s29 + $0x78] sm:$0xff] %v185_v15  ;;  %v191_v18 = vld [vmem:[%s1313_s28 + $0x110] sm:$0xff] }
  0x1e   : > { %188 = vst [vmem:[%s1318_s29 + $0x80] sm:$0xff] %v187_v16  ;;  %190 = vst [vmem:[%s1318_s29 + $0x88] sm:$0xff] %v189_v17  ;;  %v193_v19 = vld [vmem:[%s1313_s28 + $0x118] sm:$0xff]  ;;  %v195_v20 = vld [vmem:[%s1313_s28 + $0x120] sm:$0xff] }
  0x1f   : > { %192 = vst [vmem:[%s1318_s29 + $0x90] sm:$0xff] %v191_v18  ;;  %194 = vst [vmem:[%s1318_s29 + $0x98] sm:$0xff] %v193_v19  ;;  %v197_v21 = vld [vmem:[%s1313_s28 + $0x128] sm:$0xff]  ;;  %v199_v22 = vld [vmem:[%s1313_s28 + $0x130] sm:$0xff] }
  0x20   : > { %196 = vst [vmem:[%s1318_s29 + $0xa0] sm:$0xff] %v195_v20  ;;  %v201_v23 = vld [vmem:[%s1313_s28 + $0x138] sm:$0xff]  ;;  %198 = vst [vmem:[%s1318_s29 + $0xa8] sm:$0xff] %v197_v21  ;;  %v203_v24 = vld [vmem:[%s1313_s28 + $0x180] sm:$0xff] }
  0x21   : > { %200 = vst [vmem:[%s1318_s29 + $0xb0] sm:$0xff] %v199_v22  ;;  %202 = vst [vmem:[%s1318_s29 + $0xb8] sm:$0xff] %v201_v23  ;;  %v205_v25 = vld [vmem:[%s1313_s28 + $0x188] sm:$0xff]  ;;  %v207_v26 = vld [vmem:[%s1313_s28 + $0x190] sm:$0xff] }
  0x22   : > { %204 = vst [vmem:[%s1318_s29 + $0xc0] sm:$0xff] %v203_v24  ;;  %206 = vst [vmem:[%s1318_s29 + $0xc8] sm:$0xff] %v205_v25  ;;  %v209_v27 = vld [vmem:[%s1313_s28 + $0x198] sm:$0xff]  ;;  %v211_v28 = vld [vmem:[%s1313_s28 + $0x1a0] sm:$0xff] }
  0x23   : > { %208 = vst [vmem:[%s1318_s29 + $0xd0] sm:$0xff] %v207_v26  ;;  %v213_v29 = vld [vmem:[%s1313_s28 + $0x1a8] sm:$0xff]  ;;  %210 = vst [vmem:[%s1318_s29 + $0xd8] sm:$0xff] %v209_v27  ;;  %v215_v30 = vld [vmem:[%s1313_s28 + $0x1b0] sm:$0xff] }
  0x24   : > { %212 = vst [vmem:[%s1318_s29 + $0xe0] sm:$0xff] %v211_v28  ;;  %214 = vst [vmem:[%s1318_s29 + $0xe8] sm:$0xff] %v213_v29  ;;  %v217_v31 = vld [vmem:[%s1313_s28 + $0x1b8] sm:$0xff] }
  0x25   : > { %216 = vst [vmem:[%s1318_s29 + $0xf0] sm:$0xff] %v215_v30  ;;  %218 = vst [vmem:[%s1318_s29 + $0xf8] sm:$0xff] %v217_v31 }
  0x26 PF: > { %s225_s30 = sand.u32 1, %s1234_s14   ;;  %s1139_s4 = sshll.u32 %s1238_s15, 8 }
  0x27   : > { %s1088_s5 = sshll.u32 %s225_s30, 4  ;;  %s1386_s8 = scalar_lea.hbm %s1526_s2, %s1139_s4 }
  0x28   : > { %s229_s9 = scalar_lea.vmem [#allocation3], %s1088_s5  ;;  %s226_s11 = scalar_lea.sflag [#allocation4], %s225_s30 }
  0x29   : > { %s237_s10 = sshll.u32 %s229_s9, 4  ;;  %s1176_s12 = scalar_lea.hbm %s1386_s8, 256  ;;  %s238_s10 = int_to_ptr.vmem [resolvable:$true] %s237_s10 }
  0x2a   : > { %p1177_p8 = scmp.ne.s32.totalorder %s1386_s8, %s1176_s12  ;;  %s1180_s23 = scalar_lea.hbm %s1526_s2, 512 }
  0x2b   : > { %p1181_p11 = scmp.lt.u32.totalorder %s1386_s8, %s1526_s2  ;;  %p1182_p12 = scmp.lt.u32.totalorder %s1180_s23, %s1176_s12 }
  0x2c   : > { %p1178_p9 = pnand %p1177_p8, %p1295_p4  ;;  %p1184_p0 = scmp.lt.u32.totalorder %s1176_s12, %s1386_s8 }
  0x2d   : > { %p1183_p13 = por %p1182_p12, %p1181_p11 }
  0x2e   : > { %p1179_p10 = pneg %p1178_p9 }
  0x2f   : > { %p1185_p1 = por %p1184_p0, %p1183_p13 }
  0x31   : > { %p1186_p2 = pnand %p1185_p1, %p1179_p10 }
  0x33   : > { %1189 = shalt.err (!%p1186_p2)
}
  0x34   : > { %s1190_s26 = scalar_lea.vmem %s238_s10, 256  ;;  %s1240_s27 = smov [#allocation3]  }
  0x35   : > { %p1191_p3 = scmp.ne.s32.totalorder %s238_s10, %s1190_s26  ;;  %s1194_s28 = sshll.u32 %s1240_s27, 4  ;;  %s1195_s28 = int_to_ptr.vmem [resolvable:$false] %s1194_s28 }
  0x36   : > { %s1196_s29 = scalar_lea.vmem %s1195_s28, 512  ;;  %p1197_p8 = scmp.lt.s32.totalorder %s238_s10, %s1195_s28 }
  0x37   : > { %p1192_p5 = pnand %p1191_p3, %p1295_p4  ;;  %p1198_p9 = scmp.lt.s32.totalorder %s1196_s29, %s1190_s26 }
  0x39   : > { %p1193_p7 = pneg %p1192_p5  ;;  %p1199_p6 = por %p1198_p9, %p1197_p8 }
  0x3b   : > { %p1200_p11 = pnand %p1199_p6, %p1193_p7 }
  0x3d   : > { %1203 = shalt.err (!%p1200_p11)
}
  0x3e   : > { %1140 = dma.hbm_to_vmem [thread:$0]  (%p1295_p4), %s1386_s8, 256, %s238_s10, %s226_s11  }
  0x3f PF: > { %p1091_p10 = scmp.ge.s32.totalorder %s1238_s15, 1  ;;  %p242_p12 = scmp.lt.s32.totalorder %s1238_s15, 3 }
  0x41   : > { %p243_p13 = pnand %p1091_p10, %p242_p12 }
  0x42   : > { %s249_s30 = sand.u32 (!%p243_p13), 1, %s1230_s13   ;;  %p1531_p6 = scmp.ne.s32.totalorder (!%p243_p13), %s1530_s22, 0 }
  0x43   : > { %246 = sbr.rel (%p243_p13) target bundleno = 333 (0x14d), region = 51  ;;  %s1092_s4 = sshll.u32 (!%p243_p13), %s249_s30, 8 }
  0x44   : > { %s1093_s5 = sshll.u32 (!%p243_p13), %s249_s30, 4  ;;  %s1408_s6 = scalar_lea.vmem (!%p243_p13), [#allocation2], %s1092_s4 }
  0x45   : > { %s256_s7 = scalar_lea.sflag (!%p243_p13), [#allocation4], %s249_s30  ;;  %s1410_s9 = scalar_lea.vmem (!%p243_p13), [#allocation3], %s1093_s5 }
  0x4a   : > { %1221 = dma.done.wait (%p1531_p6), %s256_s7, 256  }
  0x4b   : > { %1223 = vsyncadd (%p1531_p6), %s256_s7, 4294967040  ;;  %v1241_v32 = vmov 0   ;;  %v296_v33 = vld [vmem:[%s1408_s6] sm:$0xff]  ;;  %v297_v35 = vld [vmem:[%s1408_s6 + $0x8] sm:$0xff]  ;;  %vm572_vm0 = vcmask 261120   ;;  %s1094_s8 = sshll.u32 %s1081_s16, 4 }
  0x4c   : > { %608 = vmatprep.mubr.bf16.mxu0 %v1241_v32  ;;  %649 = vmatprep.mubr.bf16.mxu1 %v1241_v32  ;;  %v304_v34 = vld [vmem:[%s1408_s6 + $0x40] sm:$0xff]  ;;  %v305_v37 = vld [vmem:[%s1408_s6 + $0x48] sm:$0xff]  ;;  %v298_v47 = vld [vmem:[%s1408_s6 + $0x10] sm:$0xff]  ;;  %p289_p4 = scmp.lt.s32.totalorder %s1094_s8, 31 }
  0x4d   : > { %v1097_v36 = vcombine.high %v296_v33, %v304_v34  ;;  %v1096_v38 = vcombine.low %v296_v33, %v304_v34  ;;  %v312_v39 = vld [vmem:[%s1408_s6 + $0x80] sm:$0xff]  ;;  %v1099_v41 = vcombine.high %v297_v35, %v305_v37  ;;  %v1098_v42 = vcombine.low %v297_v35, %v305_v37  ;;  %v313_v44 = vld [vmem:[%s1408_s6 + $0x88] sm:$0xff]  ;;  %v306_v48 = vld [vmem:[%s1408_s6 + $0x50] sm:$0xff] }
  0x4e   : > { %v320_v40 = vld [vmem:[%s1408_s6 + $0xc0] sm:$0xff]  ;;  %v321_v45 = vld [vmem:[%s1408_s6 + $0xc8] sm:$0xff]  ;;  %v299_v49 = vld [vmem:[%s1408_s6 + $0x18] sm:$0xff]  ;;  %v1101_v53 = vcombine.high %v298_v47, %v306_v48  ;;  %v1100_v60 = vcombine.low %v298_v47, %v306_v48  ;;  %v332_v35 = vlaneseq  ;;  %s1537_s8 = smov (!%p289_p4, %s1094_s8), 31 }
  0x4f   : > { %v1113_v43 = vcombine.high %v312_v39, %v320_v40  ;;  %576 = vmatprep.subr.bf16.mxu0 %v1097_v36  ;;  %v1115_v46 = vcombine.high %v313_v44, %v321_v45  ;;  %617 = vmatprep.subr.bf16.mxu1 %v1099_v41  ;;  %v1112_v50 = vcombine.low %v312_v39, %v320_v40  ;;  %v307_v51 = vld [vmem:[%s1408_s6 + $0x58] sm:$0xff]  ;;  %v314_v55 = vld [vmem:[%s1408_s6 + $0x90] sm:$0xff]  ;;  %v1437_v59 = vld [vmem:[%s1524_s0] sm:$0x1]  ;;  %s1095_s15 = sshll.u32 %s1537_s8, 1 }
  0x50   : > { %577 = vmatpush1.bf16.msra.mxu0 %v1096_v38  ;;  %618 = vmatpush1.bf16.msra.mxu1 %v1098_v42  ;;  %v1114_v52 = vcombine.low %v313_v44, %v321_v45  ;;  %v1103_v54 = vcombine.high %v299_v49, %v307_v51  ;;  %v322_v56 = vld [vmem:[%s1408_s6 + $0xd0] sm:$0xff]  ;;  %v315_v57 = vld [vmem:[%s1408_s6 + $0x98] sm:$0xff]  ;;  %v1102_v61 = vcombine.low %v299_v49, %v307_v51  ;;  %v300_v0 = vld [vmem:[%s1408_s6 + $0x20] sm:$0xff]  ;;  %v1477_v36 = vshrl.u32 %v332_v35, 7  ;;  %s1498_s11 = scalar_lea.vmem %s1527_s3, %s1095_s15 }
  0x51   : > { %578 = vmatprep.subr.bf16.mxu0 %v1113_v43  ;;  %619 = vmatprep.subr.bf16.mxu1 %v1115_v46  ;;  %v323_v58 = vld [vmem:[%s1408_s6 + $0xd8] sm:$0xff]  ;;  %v1117_v62 = vcombine.high %v314_v55, %v322_v56  ;;  %v308_v1 = vld [vmem:[%s1408_s6 + $0x60] sm:$0xff]  ;;  %v301_v2 = vld [vmem:[%s1408_s6 + $0x28] sm:$0xff]  ;;  %v1116_v4 = vcombine.low %v314_v55, %v322_v56  ;;  %v1242_v38 = vmov 1983009808  }
  0x52   : > { %v1119_v63 = vcombine.high %v315_v57, %v323_v58  ;;  %v309_v3 = vld [vmem:[%s1408_s6 + $0x68] sm:$0xff]  ;;  %v1118_v5 = vcombine.low %v315_v57, %v323_v58  ;;  %v1105_v6 = vcombine.high %v300_v0, %v308_v1  ;;  %v316_v8 = vld [vmem:[%s1408_s6 + $0xa0] sm:$0xff]  ;;  %v1104_v12 = vcombine.low %v300_v0, %v308_v1  ;;  %v302_v16 = vld [vmem:[%s1408_s6 + $0x30] sm:$0xff] }
  0x53   : > { %v1107_v7 = vcombine.high %v301_v2, %v309_v3  ;;  %v324_v9 = vld [vmem:[%s1408_s6 + $0xe0] sm:$0xff]  ;;  %v317_v10 = vld [vmem:[%s1408_s6 + $0xa8] sm:$0xff]  ;;  %v1106_v13 = vcombine.low %v301_v2, %v309_v3  ;;  %v310_v17 = vld [vmem:[%s1408_s6 + $0x70] sm:$0xff]  ;;  %v334_v37 = vsub.s32 0, %v1477_v36  ;;  %v923_v39 = vunpack.c.l.s4 %v1242_v38 }
  0x54   : > { %579 = vmatpush1.bf16.msra.mxu0 %v1112_v50  ;;  %620 = vmatpush1.bf16.msra.mxu1 %v1114_v52  ;;  %v325_v11 = vld [vmem:[%s1408_s6 + $0xe8] sm:$0xff]  ;;  %v1121_v14 = vcombine.high %v316_v8, %v324_v9  ;;  %v303_v18 = vld [vmem:[%s1408_s6 + $0x38] sm:$0xff]  ;;  %v1120_v20 = vcombine.low %v316_v8, %v324_v9  ;;  %v1109_v22 = vcombine.high %v302_v16, %v310_v17  ;;  %v318_v24 = vld [vmem:[%s1408_s6 + $0xb0] sm:$0xff]  ;;  %v342_v41 = vsub.s32 2, %v1477_v36 }
  0x55   : > { %658 = vmatprep.subr.bf16.mxu0 %v1101_v53  ;;  %699 = vmatprep.subr.bf16.mxu1 %v1103_v54  ;;  %v1123_v15 = vcombine.high %v317_v10, %v325_v11  ;;  %v311_v19 = vld [vmem:[%s1408_s6 + $0x78] sm:$0xff]  ;;  %v1122_v21 = vcombine.low %v317_v10, %v325_v11  ;;  %v326_v25 = vld [vmem:[%s1408_s6 + $0xf0] sm:$0xff]  ;;  %v1108_v28 = vcombine.low %v302_v16, %v310_v17  ;;  %v346_v42 = vsub.s32 3, %v1477_v36 }
  0x56   : > { %v1111_v23 = vcombine.high %v303_v18, %v311_v19  ;;  %v319_v26 = vld [vmem:[%s1408_s6 + $0xb8] sm:$0xff]  ;;  %v1110_v29 = vcombine.low %v303_v18, %v311_v19  ;;  %v1125_v30 = vcombine.high %v318_v24, %v326_v25  ;;  %v1124_v33 = vcombine.low %v318_v24, %v326_v25  ;;  %v328_v40 = vld [vmem:[%s1410_s9] sm:$0xff] }
  0x57   : > { %1128 = vmatmul.mubr.msk.bf16.vlgmr.msra.gmra.mrb[0].mxu0 %vm572_vm0, %v1437_v59  ;;  %1129 = vmatmul.mubr.msk.bf16.vlgmr.msra.gmra.mrb[0].mxu1 %vm572_vm0, %v1437_v59  ;;  %v327_v27 = vld [vmem:[%s1408_s6 + $0xf8] sm:$0xff]  ;;  %v335_v43 = vrot.slane %v328_v40, %v334_v37  ;;  %v924_v44 = vunpack.c.0.s8 %v923_v39  ;;  %v343_v45 = vrot.slane %v328_v40, %v342_v41  ;;  %v347_v47 = vrot.slane %v328_v40, %v346_v42 }
  0x58   : > { %659 = vmatpush1.bf16.msra.mxu0 %v1100_v60  ;;  %700 = vmatpush1.bf16.msra.mxu1 %v1102_v61  ;;  %v1127_v31 = vcombine.high %v319_v26, %v327_v27  ;;  %v1126_v34 = vcombine.low %v319_v26, %v327_v27  ;;  %v350_v53 = vsub.s32 4, %v1477_v36  ;;  %v358_v58 = vsub.s32 6, %v1477_v36  ;;  %v329_v18 = vld [vmem:[%s1410_s9 + $0x8] sm:$0xff] }
  0x59   : > { %660 = vmatprep.subr.bf16.mxu0 %v1117_v62  ;;  %701 = vmatprep.subr.bf16.mxu1 %v1119_v63  ;;  %v1487_v52 = vsub.s32 %v924_v44, %v1477_v36  ;;  %v362_v63 = vsub.s32 7, %v1477_v36  ;;  %v367_v25 = vrot.slane %v329_v18, %v334_v37  ;;  %v375_v27 = vrot.slane %v329_v18, %v342_v41 }
  0x5a   : > { %690 = vmatprep.mubr.bf16.mxu0 %v1241_v32  ;;  %731 = vmatprep.mubr.bf16.mxu1 %v1241_v32  ;;  %v351_v3 = vrot.slane %v328_v40, %v350_v53 }
  0x5b   : > { %v363_v8 = vrot.slane %v328_v40, %v362_v63 }
  0x5c   : > { %661 = vmatpush1.bf16.msra.mxu0 %v1116_v4  ;;  %702 = vmatpush1.bf16.msra.mxu1 %v1118_v5  ;;  %v359_v5 = vrot.slane %v328_v40, %v358_v58 }
  0x5d   : > { %740 = vmatprep.subr.bf16.mxu0 %v1105_v6  ;;  %781 = vmatprep.subr.bf16.mxu1 %v1107_v7 }
  0x5f   : > { %1130 = vmatmul.mubr.msk.bf16.vlgmr.msra.gmra.mrb[4].mxu0 %vm572_vm0, %v1437_v59  ;;  %1131 = vmatmul.mubr.msk.bf16.vlgmr.msra.gmra.mrb[4].mxu1 %vm572_vm0, %v1437_v59 }
  0x60   : > { %741 = vmatpush1.bf16.msra.mxu0 %v1104_v12  ;;  %782 = vmatpush1.bf16.msra.mxu1 %v1106_v13 }
  0x61   : > { %742 = vmatprep.subr.bf16.mxu0 %v1121_v14  ;;  %783 = vmatprep.subr.bf16.mxu1 %v1123_v15 }
  0x62   : > { %772 = vmatprep.mubr.bf16.mxu0 %v1241_v32  ;;  %813 = vmatprep.mubr.bf16.mxu1 %v1241_v32 }
  0x64   : > { %743 = vmatpush1.bf16.msra.mxu0 %v1120_v20  ;;  %784 = vmatpush1.bf16.msra.mxu1 %v1122_v21 }
  0x65   : > { %822 = vmatprep.subr.bf16.mxu0 %v1109_v22  ;;  %863 = vmatprep.subr.bf16.mxu1 %v1111_v23 }
  0x67   : > { %1132 = vmatmul.mubr.msk.bf16.vlgmr.msra.gmra.mrb[8].mxu0 %vm572_vm0, %v1437_v59  ;;  %1133 = vmatmul.mubr.msk.bf16.vlgmr.msra.gmra.mrb[8].mxu1 %vm572_vm0, %v1437_v59 }
  0x68   : > { %823 = vmatpush1.bf16.msra.mxu0 %v1108_v28  ;;  %864 = vmatpush1.bf16.msra.mxu1 %v1110_v29 }
  0x69   : > { %824 = vmatprep.subr.bf16.mxu0 %v1125_v30  ;;  %865 = vmatprep.subr.bf16.mxu1 %v1127_v31  ;;  %v379_v30 = vrot.slane %v329_v18, %v346_v42 }
  0x6a   : > { %854 = vmatprep.mubr.bf16.mxu0 %v1241_v32  ;;  %895 = vmatprep.mubr.bf16.mxu1 %v1241_v32  ;;  %v338_v32 = vsub.s32 1, %v1477_v36 }
  0x6c   : > { %825 = vmatpush1.bf16.msra.mxu0 %v1124_v33  ;;  %866 = vmatpush1.bf16.msra.mxu1 %v1126_v34  ;;  %v339_v46 = vrot.slane %v328_v40, %v338_v32  ;;  %v371_v28 = vrot.slane %v329_v18, %v338_v32  ;;  %v383_v32 = vrot.slane %v329_v18, %v350_v53 }
  0x6f   : > { %1134 = vmatmul.mubr.msk.bf16.vlgmr.msra.gmra.mrb[12].mxu0 %vm572_vm0, %v1437_v59  ;;  %1135 = vmatmul.mubr.msk.bf16.vlgmr.msra.gmra.mrb[12].mxu1 %vm572_vm0, %v1437_v59  ;;  %v354_v59 = vsub.s32 5, %v1477_v36 }
  0x71   : > { %v355_v6 = vrot.slane %v328_v40, %v354_v59 }
 0x12a   : > { %v610_v48 = vpop.f32.mrb[0].mxu0  ;;  %v651_v50 = vpop.f32.mrb[0].mxu1 }
 0x12b   : > { %v611_v49 = vadd.f32 %v610_v48, %v335_v43  ;;  %v612_v51 = vpop.f32.mrb[1].mxu0  ;;  %v652_v54 = vadd.f32 %v651_v50, %v343_v45  ;;  %v653_v56 = vpop.f32.mrb[1].mxu1  ;;  %v391_v48 = vrot.slane %v329_v18, %v358_v58 }
 0x12c   : > { %v613_v55 = vadd.f32 %v612_v51, %v339_v46  ;;  %v614_v57 = vpop.f32.mrb[2].mxu0  ;;  %v654_v60 = vadd.f32 %v653_v56, %v347_v47  ;;  %v655_v61 = vpop.f32.mrb[2].mxu1  ;;  %v395_v51 = vrot.slane %v329_v18, %v362_v63 }
 0x12d   : > { %v615_v62 = vpop.f32.mrb[3].mxu0  ;;  %v656_v1 = vpop.f32.mrb[3].mxu1 }
 0x12e   : > { %v920_v0 = vcombine.low %v611_v49, %v613_v55  ;;  %v921_v2 = vcombine.low %v652_v54, %v654_v60  ;;  %v387_v49 = vrot.slane %v329_v18, %v354_v59 }
 0x130   : > { %v928_v4 = vrot.slane %v920_v0, %v1487_v52  ;;  %v935_v7 = vrot.slane %v921_v2, %v1487_v52 }
 0x132   : > { %v692_v9 = vpop.f32.mrb[4].mxu0  ;;  %v936_v10 = vcombine.low %v928_v4, %v935_v7  ;;  %v733_v12 = vpop.f32.mrb[4].mxu1 }
 0x133   : > { %v693_v11 = vadd.f32 %v692_v9, %v351_v3  ;;  %v694_v13 = vpop.f32.mrb[5].mxu0  ;;  %v734_v14 = vadd.f32 %v733_v12, %v359_v5  ;;  %v735_v16 = vpop.f32.mrb[5].mxu1 }
 0x134   : > { %v695_v15 = vadd.f32 %v694_v13, %v355_v6  ;;  %v696_v17 = vpop.f32.mrb[6].mxu0  ;;  %992 = vst [vmem:[%s1498_s11] sm:$0xff] %v936_v10  ;;  %v736_v19 = vadd.f32 %v735_v16, %v363_v8  ;;  %v737_v20 = vpop.f32.mrb[6].mxu1 }
 0x135   : > { %v697_v21 = vpop.f32.mrb[7].mxu0  ;;  %v738_v23 = vpop.f32.mrb[7].mxu1 }
 0x136   : > { %v937_v22 = vcombine.low %v693_v11, %v695_v15  ;;  %v938_v24 = vcombine.low %v734_v14, %v736_v19 }
 0x138   : > { %v945_v26 = vrot.slane %v937_v22, %v1487_v52  ;;  %v952_v29 = vrot.slane %v938_v24, %v1487_v52 }
 0x13a   : > { %v774_v31 = vpop.f32.mrb[8].mxu0  ;;  %v953_v33 = vcombine.low %v945_v26, %v952_v29  ;;  %v815_v35 = vpop.f32.mrb[8].mxu1 }
 0x13b   : > { %v775_v34 = vadd.f32 %v774_v31, %v367_v25  ;;  %v776_v36 = vpop.f32.mrb[9].mxu0  ;;  %v816_v38 = vadd.f32 %v815_v35, %v375_v27  ;;  %v817_v40 = vpop.f32.mrb[9].mxu1 }
 0x13c   : > { %v777_v39 = vadd.f32 %v776_v36, %v371_v28  ;;  %v778_v43 = vpop.f32.mrb[10].mxu0  ;;  %993 = vst [vmem:[%s1498_s11 + $0x8] sm:$0xff] %v953_v33  ;;  %v818_v44 = vadd.f32 %v817_v40, %v379_v30  ;;  %v819_v45 = vpop.f32.mrb[10].mxu1 }
 0x13d   : > { %v779_v37 = vpop.f32.mrb[11].mxu0  ;;  %v820_v47 = vpop.f32.mrb[11].mxu1 }
 0x13e   : > { %v954_v46 = vcombine.low %v775_v34, %v777_v39  ;;  %v955_v41 = vcombine.low %v816_v38, %v818_v44 }
 0x140   : > { %v962_v42 = vrot.slane %v954_v46, %v1487_v52  ;;  %v969_v50 = vrot.slane %v955_v41, %v1487_v52 }
 0x142   : > { %v856_v54 = vpop.f32.mrb[12].mxu0  ;;  %v970_v55 = vcombine.low %v962_v42, %v969_v50  ;;  %v897_v57 = vpop.f32.mrb[12].mxu1 }
 0x143   : > { %v857_v56 = vadd.f32 %v856_v54, %v383_v32  ;;  %v858_v60 = vpop.f32.mrb[13].mxu0  ;;  %v898_v61 = vadd.f32 %v897_v57, %v391_v48  ;;  %v899_v0 = vpop.f32.mrb[13].mxu1 }
 0x144   : > { %v859_v62 = vadd.f32 %v858_v60, %v387_v49  ;;  %v860_v1 = vpop.f32.mrb[14].mxu0  ;;  %994 = vst [vmem:[%s1498_s11 + $0x10] sm:$0xff] %v970_v55  ;;  %v900_v2 = vadd.f32 %v899_v0, %v395_v51  ;;  %v901_v53 = vpop.f32.mrb[14].mxu1 }
 0x145   : > { %v861_v3 = vpop.f32.mrb[15].mxu0  ;;  %v902_v58 = vpop.f32.mrb[15].mxu1 }
 0x146   : > { %v971_v4 = vcombine.low %v857_v56, %v859_v62  ;;  %v972_v59 = vcombine.low %v898_v61, %v900_v2 }
 0x148   : > { %v979_v5 = vrot.slane %v971_v4, %v1487_v52  ;;  %v986_v63 = vrot.slane %v972_v59, %v1487_v52 }
 0x14a   : > { %v987_v6 = vcombine.low %v979_v5, %v986_v63 }
 0x14c   : > { %995 = vst [vmem:[%s1498_s11 + $0x18] sm:$0xff] %v987_v6 }
 0x14d PF: > { %p13_p0 = scmp.ge.s32.totalorder %s1283_s17, 4   ;;  %s1532_s12 = smov %s1230_s13 }
 0x14e   : > { %s1533_s13 = smov %s1234_s14  ;;  %s1534_s14 = smov %s1293_s20 }
 0x14f   : > { %s1535_s15 = smov %s1283_s17  ;;  %15 = sbr.rel (!%p13_p0) target bundleno = 3 (0x3), region = 103 }
 0x156   :  { %1018 = vsyncpa [#allocation4], 1 }
 0x157   :  { %1020 = vsyncpa [#allocation4 + $0x1], 1 }

// kernel: discriminator1block_forward.7
= control target key start
LH: loop header
LB: loop body
LE: loop exit
PB: predicated region body
PF: predicated region fallthrough
CT: control target
= control target key end

     0   :  { %s1025_s12 = smov 0   ;;  %s1027_s13 = smov 0   ;;  %s1129_s0 = inlined_call_operand.vmem [shape: bf16[2,80,1024], index: 0, kind: input, shape index: {}]   ;;  %s1130_s1 = inlined_call_operand.vmem [shape: bf16[8,80], index: 1, kind: input, shape index: {}]   ;;  %s1131_s2 = inlined_call_operand.vmem [shape: f32[8,1], index: 2, kind: input, shape index: {}]   ;;  %s1132_s3 = inlined_call_operand.vmem [shape: f32[2,8,1024], index: 3, kind: output, shape index: {}]  }
   0x1   :  { %s1029_s14 = smov 0  }
   0x2 LB: > { %s32_s15 = sadd.s32 1, %s998_s13  ;;  %p902_p0 = scmp.ge.s32.totalorder %s1002_s14, 1  ;;  %s1002_s14 = sphi %s1029_s14, %s13_s14   ;;  %s998_s13 = sphi %s1027_s13, %s1134_s13   ;;  %s994_s12 = sphi %s1025_s12, %s1133_s12  }
   0x3   : > { %p34_p1 = scmp.ge.s32.totalorder %s32_s15, 2  ;;  %p189_p2 = scmp.lt.s32.totalorder %s1002_s14, 3 }
   0x5   : > { %s1136_s15 = smov (%p34_p1, %s32_s15), 0  ;;  %p190_p3 = pnand %p902_p0, %p189_p2 }
   0x6   : > { %p234_p4 = scmp.lt.s32.totalorder (!%p190_p3), %s994_s12, 1  ;;  %v721_v0 = vld [vmem:[%s1131_s2] sm:$0xff] (!%p190_p3)  ;;  %v1004_v1 = vmov (!%p190_p3), 0   ;;  %vm526_vm0 = vcmask (!%p190_p3), 654336  }
   0x7   : > { %193 = sbr.rel (%p190_p3) target bundleno = 282 (0x11a), region = 32  ;;  %562 = vmatprep.mubr.bf16.mxu0 (!%p190_p3), %v1004_v1  ;;  %603 = vmatprep.mubr.bf16.mxu1 (!%p190_p3), %v1004_v1  ;;  %v285_v52 = vld [vmem:[%s1130_s1] sm:$0xf] (!%p190_p3) }
   0x8   : > { %979 = vset.pattern.permute.xlu0 (!%p190_p3), %v1004_v1 }
   0x9   : > { %724 = vperm.xlu0 (!%p190_p3), %979, %v721_v0  }
   0xe   : > { %s1138_s12 = smov (!%p234_p4, %s994_s12), 1 }
   0xf   : > { %s953_s18 = smul.u32 320, %s1138_s12  ;;  %s952_s24 = sshll.u32 %s1138_s12, 6 }
  0x10   : > { %s1110_s27 = scalar_lea.vmem %s1132_s3, %s952_s24 }
  0x11   : > { %s1055_s21 = scalar_lea.vmem %s1129_s0, %s953_s18 }
  0x12   : > { %v286_v2 = vld [vmem:[%s1055_s21] sm:$0xff]  ;;  %v287_v4 = vld [vmem:[%s1055_s21 + $0x8] sm:$0xff]  ;;  %v288_v40 = vld [vmem:[%s1055_s21 + $0x10] sm:$0xff] }
  0x13   : > { %v290_v3 = vld [vmem:[%s1055_s21 + $0x20] sm:$0xff]  ;;  %v291_v6 = vld [vmem:[%s1055_s21 + $0x28] sm:$0xff]  ;;  %v292_v41 = vld [vmem:[%s1055_s21 + $0x30] sm:$0xff] }
  0x14   : > { %v907_v5 = vcombine.high %v286_v2, %v290_v3  ;;  %v906_v7 = vcombine.low %v286_v2, %v290_v3  ;;  %v294_v8 = vld [vmem:[%s1055_s21 + $0x40] sm:$0xff]  ;;  %v909_v10 = vcombine.high %v287_v4, %v291_v6  ;;  %v908_v11 = vcombine.low %v287_v4, %v291_v6  ;;  %v295_v13 = vld [vmem:[%s1055_s21 + $0x48] sm:$0xff]  ;;  %v289_v42 = vld [vmem:[%s1055_s21 + $0x18] sm:$0xff] }
  0x15   : > { %v298_v9 = vld [vmem:[%s1055_s21 + $0x60] sm:$0xff]  ;;  %v299_v14 = vld [vmem:[%s1055_s21 + $0x68] sm:$0xff]  ;;  %v293_v43 = vld [vmem:[%s1055_s21 + $0x38] sm:$0xff]  ;;  %v911_v46 = vcombine.high %v288_v40, %v292_v41  ;;  %v910_v53 = vcombine.low %v288_v40, %v292_v41 }
  0x16   : > { %v915_v12 = vcombine.high %v294_v8, %v298_v9  ;;  %v302_v15 = vld [vmem:[%s1055_s21 + $0x80] sm:$0xff]  ;;  %530 = vmatprep.subr.bf16.mxu0 %v907_v5  ;;  %v917_v16 = vcombine.high %v295_v13, %v299_v14  ;;  %v303_v18 = vld [vmem:[%s1055_s21 + $0x88] sm:$0xff]  ;;  %571 = vmatprep.subr.bf16.mxu1 %v909_v10  ;;  %v914_v20 = vcombine.low %v294_v8, %v298_v9  ;;  %v296_v48 = vld [vmem:[%s1055_s21 + $0x50] sm:$0xff] }
  0x17   : > { %v306_v17 = vld [vmem:[%s1055_s21 + $0xa0] sm:$0xff]  ;;  %v307_v19 = vld [vmem:[%s1055_s21 + $0xa8] sm:$0xff]  ;;  %531 = vmatpush1.bf16.msra.mxu0 %v906_v7  ;;  %572 = vmatpush1.bf16.msra.mxu1 %v908_v11  ;;  %v916_v21 = vcombine.low %v295_v13, %v299_v14  ;;  %v913_v47 = vcombine.high %v289_v42, %v293_v43  ;;  %v300_v49 = vld [vmem:[%s1055_s21 + $0x70] sm:$0xff]  ;;  %v912_v54 = vcombine.low %v289_v42, %v293_v43 }
  0x18   : > { %532 = vmatprep.subr.bf16.mxu0 %v915_v12  ;;  %v923_v22 = vcombine.high %v302_v15, %v306_v17  ;;  %573 = vmatprep.subr.bf16.mxu1 %v917_v16  ;;  %v925_v23 = vcombine.high %v303_v18, %v307_v19  ;;  %v310_v24 = vld [vmem:[%s1055_s21 + $0xc0] sm:$0xff]  ;;  %v311_v26 = vld [vmem:[%s1055_s21 + $0xc8] sm:$0xff]  ;;  %v922_v28 = vcombine.low %v302_v15, %v306_v17  ;;  %v297_v50 = vld [vmem:[%s1055_s21 + $0x58] sm:$0xff] }
  0x19   : > { %v314_v25 = vld [vmem:[%s1055_s21 + $0xe0] sm:$0xff]  ;;  %v315_v27 = vld [vmem:[%s1055_s21 + $0xe8] sm:$0xff]  ;;  %v924_v29 = vcombine.low %v303_v18, %v307_v19  ;;  %v301_v51 = vld [vmem:[%s1055_s21 + $0x78] sm:$0xff]  ;;  %v919_v55 = vcombine.high %v296_v48, %v300_v49  ;;  %v918_v61 = vcombine.low %v296_v48, %v300_v49 }
  0x1a   : > { %v931_v30 = vcombine.high %v310_v24, %v314_v25  ;;  %v933_v31 = vcombine.high %v311_v26, %v315_v27  ;;  %v318_v32 = vld [vmem:[%s1055_s21 + $0x100] sm:$0xff]  ;;  %v319_v34 = vld [vmem:[%s1055_s21 + $0x108] sm:$0xff]  ;;  %v930_v36 = vcombine.low %v310_v24, %v314_v25  ;;  %v932_v37 = vcombine.low %v311_v26, %v315_v27  ;;  %v304_v57 = vld [vmem:[%s1055_s21 + $0x90] sm:$0xff] }
  0x1b   : > { %533 = vmatpush1.bf16.msra.mxu0 %v914_v20  ;;  %574 = vmatpush1.bf16.msra.mxu1 %v916_v21  ;;  %v322_v33 = vld [vmem:[%s1055_s21 + $0x120] sm:$0xff]  ;;  %v323_v35 = vld [vmem:[%s1055_s21 + $0x128] sm:$0xff]  ;;  %v921_v56 = vcombine.high %v297_v50, %v301_v51  ;;  %v308_v58 = vld [vmem:[%s1055_s21 + $0xb0] sm:$0xff]  ;;  %v920_v62 = vcombine.low %v297_v50, %v301_v51 }
  0x1c   : > { %534 = vmatprep.subr.bf16.mxu0 %v923_v22  ;;  %575 = vmatprep.subr.bf16.mxu1 %v925_v23  ;;  %v939_v38 = vcombine.high %v318_v32, %v322_v33  ;;  %v941_v39 = vcombine.high %v319_v34, %v323_v35  ;;  %v938_v44 = vcombine.low %v318_v32, %v322_v33  ;;  %v305_v59 = vld [vmem:[%s1055_s21 + $0x98] sm:$0xff]  ;;  %v312_v2 = vld [vmem:[%s1055_s21 + $0xd0] sm:$0xff] }
  0x1d   : > { %v940_v45 = vcombine.low %v319_v34, %v323_v35  ;;  %v309_v60 = vld [vmem:[%s1055_s21 + $0xb8] sm:$0xff]  ;;  %v927_v63 = vcombine.high %v304_v57, %v308_v58  ;;  %v316_v3 = vld [vmem:[%s1055_s21 + $0xf0] sm:$0xff]  ;;  %v926_v6 = vcombine.low %v304_v57, %v308_v58 }
  0x1e   : > { %v929_v0 = vcombine.high %v305_v59, %v309_v60  ;;  %v313_v4 = vld [vmem:[%s1055_s21 + $0xd8] sm:$0xff]  ;;  %v928_v7 = vcombine.low %v305_v59, %v309_v60  ;;  %v935_v8 = vcombine.high %v312_v2, %v316_v3  ;;  %v320_v10 = vld [vmem:[%s1055_s21 + $0x110] sm:$0xff]  ;;  %v934_v14 = vcombine.low %v312_v2, %v316_v3 }
  0x1f   : > { %535 = vmatpush1.bf16.msra.mxu0 %v922_v28  ;;  %576 = vmatpush1.bf16.msra.mxu1 %v924_v29  ;;  %v317_v5 = vld [vmem:[%s1055_s21 + $0xf8] sm:$0xff]  ;;  %v324_v11 = vld [vmem:[%s1055_s21 + $0x130] sm:$0xff] }
  0x20   : > { %536 = vmatprep.subr.bf16.mxu0 %v931_v30  ;;  %577 = vmatprep.subr.bf16.mxu1 %v933_v31  ;;  %v937_v9 = vcombine.high %v313_v4, %v317_v5  ;;  %v321_v12 = vld [vmem:[%s1055_s21 + $0x118] sm:$0xff]  ;;  %v936_v15 = vcombine.low %v313_v4, %v317_v5  ;;  %v943_v16 = vcombine.high %v320_v10, %v324_v11 }
  0x21   : > { %v325_v13 = vld [vmem:[%s1055_s21 + $0x138] sm:$0xff]  ;;  %v942_v17 = vcombine.low %v320_v10, %v324_v11 }
  0x22   : > { %v944_v18 = vcombine.low %v321_v12, %v325_v13 }
  0x23   : > { %537 = vmatpush1.bf16.msra.mxu0 %v930_v36  ;;  %578 = vmatpush1.bf16.msra.mxu1 %v932_v37 }
  0x24   : > { %538 = vmatprep.subr.bf16.mxu0 %v939_v38  ;;  %579 = vmatprep.subr.bf16.mxu1 %v941_v39 }
  0x27   : > { %539 = vmatpush1.bf16.msra.mxu0 %v938_v44  ;;  %580 = vmatpush1.bf16.msra.mxu1 %v940_v45 }
  0x28   : > { %612 = vmatprep.subr.bf16.mxu0 %v911_v46  ;;  %653 = vmatprep.subr.bf16.mxu1 %v913_v47 }
  0x2a   : > { %946 = vmatmul.mubr.msk.bf16.vlgmr.msra.gmra.mrb[0].mxu0 %vm526_vm0, %v285_v52  ;;  %947 = vmatmul.mubr.msk.bf16.vlgmr.msra.gmra.mrb[0].mxu1 %vm526_vm0, %v285_v52 }
  0x2b   : > { %613 = vmatpush1.bf16.msra.mxu0 %v910_v53  ;;  %654 = vmatpush1.bf16.msra.mxu1 %v912_v54 }
  0x2c   : > { %614 = vmatprep.subr.bf16.mxu0 %v919_v55  ;;  %655 = vmatprep.subr.bf16.mxu1 %v921_v56 }
  0x2d   : > { %644 = vmatprep.mubr.bf16.mxu0 %v1004_v1  ;;  %685 = vmatprep.mubr.bf16.mxu1 %v1004_v1  ;;  %v945_v1 = vcombine.high %v321_v12, %v325_v13 }
  0x2f   : > { %615 = vmatpush1.bf16.msra.mxu0 %v918_v61  ;;  %656 = vmatpush1.bf16.msra.mxu1 %v920_v62 }
  0x30   : > { %616 = vmatprep.subr.bf16.mxu0 %v927_v63  ;;  %657 = vmatprep.subr.bf16.mxu1 %v929_v0 }
  0x33   : > { %617 = vmatpush1.bf16.msra.mxu0 %v926_v6  ;;  %658 = vmatpush1.bf16.msra.mxu1 %v928_v7 }
  0x34   : > { %618 = vmatprep.subr.bf16.mxu0 %v935_v8  ;;  %659 = vmatprep.subr.bf16.mxu1 %v937_v9 }
  0x37   : > { %619 = vmatpush1.bf16.msra.mxu0 %v934_v14  ;;  %660 = vmatpush1.bf16.msra.mxu1 %v936_v15 }
  0x38   : > { %620 = vmatprep.subr.bf16.mxu0 %v943_v16  ;;  %661 = vmatprep.subr.bf16.mxu1 %v945_v1 }
  0x3b   : > { %621 = vmatpush1.bf16.msra.mxu0 %v942_v17  ;;  %662 = vmatpush1.bf16.msra.mxu1 %v944_v18 }
  0x3e   : > { %948 = vmatmul.mubr.msk.bf16.vlgmr.msra.gmra.mrb[4].mxu0 %vm526_vm0, %v285_v52  ;;  %949 = vmatmul.mubr.msk.bf16.vlgmr.msra.gmra.mrb[4].mxu1 %vm526_vm0, %v285_v52 }
  0x88   : > { %v725_v19 = vpop.permute.xlu0 %724 }
  0xfd   : > { %v564_v20 = vpop.f32.mrb[0].mxu0  ;;  %v605_v22 = vpop.f32.mrb[0].mxu1 }
  0xfe   : > { %v727_v21 = vadd.f32 %v725_v19, %v564_v20  ;;  %v566_v23 = vpop.f32.mrb[1].mxu0  ;;  %v729_v24 = vadd.f32 %v725_v19, %v605_v22  ;;  %v607_v26 = vpop.f32.mrb[1].mxu1 }
  0xff   : > { %v728_v25 = vadd.f32 %v725_v19, %v566_v23  ;;  %v568_v27 = vpop.f32.mrb[2].mxu0  ;;  %v730_v29 = vadd.f32 %v725_v19, %v607_v26  ;;  %v609_v30 = vpop.f32.mrb[2].mxu1 }
 0x100   : > { %vm735_vm1 = vcmp.ge.f32.partialorder %v727_v21, 0.0  ;;  %v743_v28 = vmul.f32 0.2, %v727_v21  ;;  %v569_v31 = vpop.f32.mrb[3].mxu0  ;;  %vm737_vm2 = vcmp.ge.f32.partialorder %v729_v24, 0.0  ;;  %v610_v36 = vpop.f32.mrb[3].mxu1 }
 0x101   : > { %v745_v32 = vmul.f32 0.2, %v729_v24  ;;  %vm736_vm3 = vcmp.ge.f32.partialorder %v728_v25, 0.0  ;;  %v744_v33 = vmul.f32 0.2, %v728_v25  ;;  %vm738_vm4 = vcmp.ge.f32.partialorder %v730_v29, 0.0 }
 0x102   : > { %v751_v34 = vsel %vm735_vm1, %v727_v21, %v743_v28  ;;  %v746_v35 = vmul.f32 0.2, %v730_v29 }
 0x103   : > { %759 = vst [vmem:[%s1110_s27] sm:$0xff] %v751_v34  ;;  %v753_v37 = vsel %vm737_vm2, %v729_v24, %v745_v32  ;;  %v752_v38 = vsel %vm736_vm3, %v728_v25, %v744_v33 }
 0x104   : > { %761 = vst [vmem:[%s1110_s27 + $0x10] sm:$0xff] %v753_v37  ;;  %760 = vst [vmem:[%s1110_s27 + $0x8] sm:$0xff] %v752_v38  ;;  %v754_v39 = vsel %vm738_vm4, %v730_v29, %v746_v35 }
 0x105   : > { %762 = vst [vmem:[%s1110_s27 + $0x18] sm:$0xff] %v754_v39 }
 0x111   : > { %v646_v40 = vpop.f32.mrb[4].mxu0  ;;  %v687_v42 = vpop.f32.mrb[4].mxu1 }
 0x112   : > { %v731_v41 = vadd.f32 %v725_v19, %v646_v40  ;;  %v648_v43 = vpop.f32.mrb[5].mxu0  ;;  %v733_v44 = vadd.f32 %v725_v19, %v687_v42  ;;  %v689_v46 = vpop.f32.mrb[5].mxu1 }
 0x113   : > { %v732_v45 = vadd.f32 %v725_v19, %v648_v43  ;;  %v650_v47 = vpop.f32.mrb[6].mxu0  ;;  %v734_v49 = vadd.f32 %v725_v19, %v689_v46  ;;  %v691_v50 = vpop.f32.mrb[6].mxu1 }
 0x114   : > { %vm739_vm5 = vcmp.ge.f32.partialorder %v731_v41, 0.0  ;;  %v747_v48 = vmul.f32 0.2, %v731_v41  ;;  %v651_v51 = vpop.f32.mrb[7].mxu0  ;;  %vm741_vm6 = vcmp.ge.f32.partialorder %v733_v44, 0.0  ;;  %v692_v56 = vpop.f32.mrb[7].mxu1 }
 0x115   : > { %v749_v52 = vmul.f32 0.2, %v733_v44  ;;  %vm740_vm7 = vcmp.ge.f32.partialorder %v732_v45, 0.0  ;;  %v748_v53 = vmul.f32 0.2, %v732_v45  ;;  %vm742_vm8 = vcmp.ge.f32.partialorder %v734_v49, 0.0 }
 0x116   : > { %v755_v54 = vsel %vm739_vm5, %v731_v41, %v747_v48  ;;  %v750_v55 = vmul.f32 0.2, %v734_v49 }
 0x117   : > { %763 = vst [vmem:[%s1110_s27 + $0x20] sm:$0xff] %v755_v54  ;;  %v757_v57 = vsel %vm741_vm6, %v733_v44, %v749_v52  ;;  %v756_v58 = vsel %vm740_vm7, %v732_v45, %v748_v53 }
 0x118   : > { %765 = vst [vmem:[%s1110_s27 + $0x30] sm:$0xff] %v757_v57  ;;  %764 = vst [vmem:[%s1110_s27 + $0x28] sm:$0xff] %v756_v58  ;;  %v758_v59 = vsel %vm742_vm8, %v734_v49, %v750_v55 }
 0x119   : > { %766 = vst [vmem:[%s1110_s27 + $0x38] sm:$0xff] %v758_v59 }
 0x11a PF: > { %s13_s14 = sadd.s32 1, %s1002_s14   ;;  %s1133_s12 = smov %s998_s13 }
 0x11b   : > { %p10_p5 = scmp.ge.s32.totalorder %s13_s14, 4   ;;  %s1134_s13 = smov %s1136_s15 }
 0x11d   :  { %12 = sbr.rel (!%p10_p5) target bundleno = 2 (0x2), region = 76 }

// kernel: discriminator1block_forward.8
= control target key start
LH: loop header
LB: loop body
LE: loop exit
PB: predicated region body
PF: predicated region fallthrough
CT: control target
= control target key end

     0   :  { %s809_s15 = smov 0   ;;  %s811_s16 = smov 0   ;;  %s900_s0 = inlined_call_operand.vmem [shape: bf16[2,128,256], index: 0, kind: input, shape index: {}]   ;;  %s901_s1 = inlined_call_operand.vmem [shape: bf16[16,128], index: 1, kind: input, shape index: {}]   ;;  %s902_s2 = inlined_call_operand.vmem [shape: f32[16,1], index: 2, kind: input, shape index: {}]   ;;  %s903_s3 = inlined_call_operand.vmem [shape: f32[16,1], index: 3, kind: input, shape index: {}]   ;;  %s904_s4 = inlined_call_operand.vmem [shape: f32[2,16,256], index: 4, kind: output, shape index: {}]  }
   0x1   :  { %s813_s17 = smov 0   ;;  %s815_s18 = smov 0  }
   0x2   :  { %s817_s19 = smov 0  }
   0x3 LB: > { %s29_s20 = sadd.s32 1, %s773_s17  ;;  %s33_s21 = sadd.s32 1, %s777_s18  ;;  %s781_s19 = sphi %s817_s19, %s14_s19   ;;  %s777_s18 = sphi %s815_s18, %s908_s18   ;;  %s773_s17 = sphi %s813_s17, %s907_s17   ;;  %s769_s16 = sphi %s811_s16, %s906_s16   ;;  %s765_s15 = sphi %s809_s15, %s905_s15  }
   0x4   : > { %p31_p0 = scmp.ge.s32.totalorder %s29_s20, 2  ;;  %p646_p1 = scmp.ge.s32.totalorder %s781_s19, 1 }
   0x5   : > { %p223_p2 = scmp.lt.s32.totalorder %s781_s19, 5 }
   0x6   : > { %s910_s20 = smov (%p31_p0, %s29_s20), 0  ;;  %s912_s21 = smov (!%p31_p0, %s33_s21), %s777_s18 }
   0x7   : > { %p224_p3 = pnand %p646_p1, %p223_p2  ;;  %p35_p4 = scmp.ge.s32.totalorder %s912_s21, 2 }
   0x8   : > { %p274_p5 = scmp.lt.s32.totalorder (!%p224_p3), %s769_s16, 1  ;;  %v783_v0 = vmov (!%p224_p3), 0   ;;  %p284_p6 = scmp.lt.s32.totalorder (!%p224_p3), %s765_s15, 1 }
   0x9   : > { %s914_s21 = smov (%p35_p4, %s912_s21), 0  ;;  %227 = sbr.rel (%p224_p3) target bundleno = 584 (0x248), region = 36 }
   0xa   : > { %446 = vmatprep.mubr.bf16.mxu0 (!%p224_p3), %v783_v0  ;;  %715 = vset.pattern.permute.xlu1 (!%p224_p3), %v783_v0 }
   0xb   : > { %716 = vset.pattern.permute.xlu0 (!%p224_p3), %v783_v0 }
  0x10   : > { %s916_s16 = smov (!%p274_p5, %s769_s16), 1  ;;  %s918_s15 = smov (!%p284_p6, %s765_s15), 1 }
  0x11   : > { %s673_s22 = sshll.u32 %s916_s16, 7  ;;  %s649_s26 = sshll.u32 %s918_s15, 2 }
  0x12   : > { %s847_s25 = scalar_lea.vmem %s900_s0, %s673_s22  ;;  %s290_s29 = scalar_lea.vmem %s901_s1, %s649_s26 }
  0x13   : > { %v717_v1 = vld [vmem:[%s847_s25 + $0x4] ss:$8 sps:$4 sm:$0xff]   ;;  %v719_v2 = vld [vmem:[%s847_s25] ss:$8 sps:$4 sm:$0xff]   ;;  %v720_v3 = vld [vmem:[%s847_s25 + $0x14] ss:$8 sps:$4 sm:$0xff]  }
  0x14   : > { %414 = vmatprep.subr.bf16.mxu0 %v717_v1  ;;  %v722_v4 = vld [vmem:[%s847_s25 + $0x10] ss:$8 sps:$4 sm:$0xff]   ;;  %v723_v5 = vld [vmem:[%s847_s25 + $0x24] ss:$8 sps:$4 sm:$0xff]   ;;  %v725_v6 = vld [vmem:[%s847_s25 + $0x20] ss:$8 sps:$4 sm:$0xff]  }
  0x15   : > { %415 = vmatpush1.bf16.msra.mxu0 %v719_v2  ;;  %v726_v7 = vld [vmem:[%s847_s25 + $0x34] ss:$8 sps:$4 sm:$0xff]   ;;  %v728_v8 = vld [vmem:[%s847_s25 + $0x30] ss:$8 sps:$4 sm:$0xff]   ;;  %v729_v9 = vld [vmem:[%s847_s25 + $0x44] ss:$8 sps:$4 sm:$0xff]  }
  0x16   : > { %416 = vmatprep.subr.bf16.mxu0 %v720_v3  ;;  %v731_v10 = vld [vmem:[%s847_s25 + $0x40] ss:$8 sps:$4 sm:$0xff]   ;;  %v732_v11 = vld [vmem:[%s847_s25 + $0x54] ss:$8 sps:$4 sm:$0xff]   ;;  %v734_v12 = vld [vmem:[%s847_s25 + $0x50] ss:$8 sps:$4 sm:$0xff]  }
  0x17   : > { %v735_v13 = vld [vmem:[%s847_s25 + $0x64] ss:$8 sps:$4 sm:$0xff]   ;;  %v737_v14 = vld [vmem:[%s847_s25 + $0x60] ss:$8 sps:$4 sm:$0xff]   ;;  %v738_v15 = vld [vmem:[%s847_s25 + $0x74] ss:$8 sps:$4 sm:$0xff]  }
  0x18   : > { %v740_v16 = vld [vmem:[%s847_s25 + $0x70] ss:$8 sps:$4 sm:$0xff]   ;;  %v317_v17 = vld [vmem:[%s290_s29] sm:$0xf]  ;;  %s650_s30 = sshll.u32 %s918_s15, 3  ;;  %s652_s11 = sshll.u32 %s918_s15, 1 }
  0x19   : > { %417 = vmatpush1.bf16.msra.mxu0 %v722_v4  ;;  %s294_s7 = scalar_lea.vmem %s902_s2, %s650_s30  ;;  %s298_s10 = scalar_lea.vmem %s903_s3, %s650_s30 }
  0x1a   : > { %418 = vmatprep.subr.bf16.mxu0 %v723_v5  ;;  %v481_v23 = vld [vmem:[%s294_s7] sm:$0xff]  ;;  %s653_s12 = sshll.u32 %s916_s16, 2 }
  0x1b   : > { %484 = vperm.xlu1 %715, %v481_v23   ;;  %v489_v24 = vld [vmem:[%s298_s10] sm:$0xff]  ;;  %s305_s13 = sadd.s32 %s653_s12, %s652_s11 }
  0x1c   : > { %s654_s14 = sshll.u32 %s305_s13, 3 }
  0x1d   : > { %419 = vmatpush1.bf16.msra.mxu0 %v725_v6  ;;  %s307_s24 = scalar_lea.vmem %s904_s4, %s654_s14 }
  0x1e   : > { %420 = vmatprep.subr.bf16.mxu0 %v726_v7 }
  0x1f   : > { %492 = vperm.xlu1 %715, %v489_v24  }
  0x21   : > { %421 = vmatpush1.bf16.msra.mxu0 %v728_v8 }
  0x22   : > { %422 = vmatprep.subr.bf16.mxu0 %v729_v9 }
  0x25   : > { %423 = vmatpush1.bf16.msra.mxu0 %v731_v10 }
  0x26   : > { %424 = vmatprep.subr.bf16.mxu0 %v732_v11 }
  0x29   : > { %425 = vmatpush1.bf16.msra.mxu0 %v734_v12 }
  0x2a   : > { %426 = vmatprep.subr.bf16.mxu0 %v735_v13 }
  0x2d   : > { %427 = vmatpush1.bf16.msra.mxu0 %v737_v14 }
  0x2e   : > { %428 = vmatprep.subr.bf16.mxu0 %v738_v15 }
  0x31   : > { %429 = vmatpush1.bf16.msra.mxu0 %v740_v16 }
  0x34   : > { %447 = vmatmul.mubr.bf16.vlgmr.msra.gmra.mrb[0].mxu0 %v317_v17 }
  0x9a   : > { %v485_v35 = vpop.permute.xlu1 %484 }
  0x9e   : > { %v493_v41 = vpop.permute.xlu1 %492 }
 0x107   : > { %v448_v18 = vpop.f32.mrb[0].mxu0 }
 0x108   : > { %v450_v19 = vpop.f32.mrb[1].mxu0 }
 0x109   : > { %v452_v20 = vpop.f32.mrb[2].mxu0  ;;  %v464_v21 = vadd.f32 %v450_v19, %v448_v18 }
 0x10a   : > { %v453_v22 = vpop.f32.mrb[3].mxu0 }
 0x10b   : > { %465 = vadd.xlane.f32.xlu0 %v464_v21 }
 0x198   : > { %v466_v25 = vpop.xlane.xlu0 %465 }
 0x199   : > { %v468_v26 = vmul.f32 0.00390625, %v466_v25 }
 0x19b   : > { %v469_v27 = vsub.f32 %v448_v18, %v468_v26  ;;  %v470_v28 = vsub.f32 %v450_v19, %v468_v26 }
 0x19d   : > { %v471_v29 = vmul.f32 %v469_v27, %v469_v27  ;;  %v472_v30 = vmul.f32 %v470_v28, %v470_v28 }
 0x19f   : > { %v473_v31 = vadd.f32 %v472_v30, %v471_v29 }
 0x1a1   : > { %474 = vadd.xlane.f32.xlu0 %v473_v31 }
 0x22e   : > { %v475_v32 = vpop.xlane.xlu0 %474 }
 0x22f   : > { %v476_v33 = vmul.f32 0.00390625, %v475_v32 }
 0x231   : > { %v477_v34 = vadd.f32 1e-05, %v476_v33 }
 0x233   : > { %741 = vrsqrt.f32 %v477_v34 }
 0x23d   : > { %v742_v36 = vpop.eup %741 }
 0x23e   : > { %v479_v37 = vmul.f32 %v742_v36, %v469_v27  ;;  %v480_v38 = vmul.f32 %v742_v36, %v470_v28 }
 0x240   : > { %v487_v39 = vmul.f32 %v485_v35, %v479_v37  ;;  %v488_v40 = vmul.f32 %v485_v35, %v480_v38 }
 0x242   : > { %v495_v42 = vadd.f32 %v493_v41, %v487_v39  ;;  %v496_v43 = vadd.f32 %v493_v41, %v488_v40 }
 0x244   : > { %vm497_vm0 = vcmp.ge.f32.partialorder %v495_v42, 0.0  ;;  %vm498_vm1 = vcmp.ge.f32.partialorder %v496_v43, 0.0  ;;  %v499_v44 = vmul.f32 0.2, %v495_v42  ;;  %v500_v45 = vmul.f32 0.2, %v496_v43 }
 0x246   : > { %v501_v46 = vsel %vm497_vm0, %v495_v42, %v499_v44  ;;  %v502_v47 = vsel %vm498_vm1, %v496_v43, %v500_v45 }
 0x247   : > { %503 = vst [vmem:[%s307_s24] sm:$0xff] %v501_v46  ;;  %504 = vst [vmem:[%s307_s24 + $0x8] sm:$0xff] %v502_v47 }
 0x248 PF: > { %s14_s19 = sadd.s32 1, %s781_s19   ;;  %s905_s15 = smov %s773_s17 }
 0x249   : > { %p11_p7 = scmp.ge.s32.totalorder %s14_s19, 6   ;;  %s906_s16 = smov %s777_s18 }
 0x24a   : > { %s907_s17 = smov %s910_s20  ;;  %s908_s18 = smov %s914_s21 }
 0x24b   :  { %13 = sbr.rel (!%p11_p7) target bundleno = 3 (0x3), region = 83 }

// kernel: discriminator1block_forward.9
= control target key start
LH: loop header
LB: loop body
LE: loop exit
PB: predicated region body
PF: predicated region fallthrough
CT: control target
= control target key end

     0   :  { %s923_s15 = smov 0   ;;  %s925_s16 = smov 0   ;;  %s1023_s0 = inlined_call_operand.vmem [shape: bf16[2,256,64], index: 0, kind: input, shape index: {}]   ;;  %s1024_s1 = inlined_call_operand.vmem [shape: bf16[32,256], index: 1, kind: input, shape index: {}]   ;;  %s1025_s2 = inlined_call_operand.vmem [shape: f32[32,1], index: 2, kind: input, shape index: {}]   ;;  %s1026_s3 = inlined_call_operand.vmem [shape: f32[32,1], index: 3, kind: input, shape index: {}]   ;;  %s1027_s4 = inlined_call_operand.vmem [shape: f32[2,32,64], index: 4, kind: output, shape index: {}]  }
   0x1   :  { %s927_s17 = smov 0   ;;  %s929_s18 = smov 0  }
   0x2   :  { %s931_s19 = smov 0  }
   0x3 LB: > { %s29_s20 = sadd.s32 1, %s886_s17  ;;  %s33_s21 = sadd.s32 1, %s890_s18  ;;  %s894_s19 = sphi %s931_s19, %s14_s19   ;;  %s890_s18 = sphi %s929_s18, %s1031_s18   ;;  %s886_s17 = sphi %s927_s17, %s1030_s17   ;;  %s882_s16 = sphi %s925_s16, %s1029_s16   ;;  %s878_s15 = sphi %s923_s15, %s1028_s15  }
   0x4   : > { %p31_p0 = scmp.ge.s32.totalorder %s29_s20, 2  ;;  %p732_p1 = scmp.ge.s32.totalorder %s894_s19, 1 }
   0x5   : > { %p231_p2 = scmp.lt.s32.totalorder %s894_s19, 5 }
   0x6   : > { %s1033_s20 = smov (%p31_p0, %s29_s20), 0  ;;  %s1035_s21 = smov (!%p31_p0, %s33_s21), %s890_s18 }
   0x7   : > { %p232_p3 = pnand %p732_p1, %p231_p2  ;;  %p35_p4 = scmp.ge.s32.totalorder %s1035_s21, 2 }
   0x8   : > { %p286_p5 = scmp.lt.s32.totalorder (!%p232_p3), %s882_s16, 1  ;;  %s735_s22 = sshll.u32 (!%p232_p3), %s878_s15, 1  ;;  %vm334_vm0 = vcmask (!%p232_p3), 523264   ;;  %v896_v18 = vmov (!%p232_p3), 0.0   ;;  %v897_v19 = vmov (!%p232_p3), 0  }
   0x9   : > { %s1037_s21 = smov (%p35_p4, %s1035_s21), 0  ;;  %235 = sbr.rel (%p232_p3) target bundleno = 598 (0x256), region = 36 }
   0xa   : > { %p297_p6 = scmp.lt.s32.totalorder (!%p232_p3), %s735_s22, 3  ;;  %335 = vst.msk [vmem:[#allocation2] sm:$0xff] (!%p232_p3), %vm334_vm0, %v896_v18  ;;  %336 = vst.msk [vmem:[#allocation2 + $0x8] sm:$0xff] (!%p232_p3), %vm334_vm0, %v896_v18  ;;  %832 = vset.pattern.permute.xlu1 (!%p232_p3), %v897_v19  ;;  %831 = vset.pattern.permute.xlu0 (!%p232_p3), %v897_v19 }
  0x10   : > { %s1039_s16 = smov (!%p286_p5, %s882_s16), 1  ;;  %s1041_s22 = smov (!%p297_p6, %s735_s22), 3 }
  0x11   : > { %s765_s23 = sshll.u32 %s1039_s16, 7  ;;  %s743_s24 = sshll.u32 %s1039_s16, 2  ;;  %v337_v23 = vld [vmem:[#allocation2] sm:$0xff]  ;;  %v338_v27 = vld [vmem:[#allocation2 + $0x8] sm:$0xff] }
  0x12   : > { %s956_s27 = scalar_lea.vmem %s1023_s0, %s765_s23  ;;  %s959_s28 = sadd.s32 %s743_s24, %s1041_s22 }
  0x13   : > { %v833_v0 = vld [vmem:[%s956_s27 + $0x40] sm:$0xff]   ;;  %v835_v2 = vld [vmem:[%s956_s27 + $0x48] sm:$0xff]   ;;  %v837_v4 = vld [vmem:[%s956_s27 + $0x50] sm:$0xff]   ;;  %s968_s29 = sshll.u32 %s1041_s22, 3  ;;  %s744_s13 = sshll.u32 %s959_s28, 3 }
  0x14   : > { %v834_v1 = vld [vmem:[%s956_s27] sm:$0xff]   ;;  %767 = vmatprep.subr.bf16.mxu0 %v833_v0  ;;  %v836_v3 = vld [vmem:[%s956_s27 + $0x8] sm:$0xff]   ;;  %v838_v5 = vld [vmem:[%s956_s27 + $0x10] sm:$0xff]   ;;  %s304_s6 = scalar_lea.vmem %s1024_s1, %s968_s29  ;;  %s311_s9 = scalar_lea.vmem %s1025_s2, %s968_s29 }
  0x15   : > { %768 = vmatpush3.bf16.msra.mxu0 %v834_v1  ;;  %v839_v6 = vld [vmem:[%s956_s27 + $0x58] sm:$0xff]   ;;  %v841_v8 = vld [vmem:[%s956_s27 + $0x60] sm:$0xff]   ;;  %v843_v10 = vld [vmem:[%s956_s27 + $0x68] sm:$0xff]   ;;  %s992_s12 = scalar_lea.vmem %s1026_s3, %s968_s29  ;;  %s327_s16 = scalar_lea.vmem %s1027_s4, %s744_s13 }
  0x16   : > { %769 = vmatprep.subr.bf16.mxu0 %v835_v2  ;;  %v840_v7 = vld [vmem:[%s956_s27 + $0x18] sm:$0xff]   ;;  %v842_v9 = vld [vmem:[%s956_s27 + $0x20] sm:$0xff]   ;;  %v844_v12 = vld [vmem:[%s956_s27 + $0x28] sm:$0xff]  }
  0x17   : > { %v851_v11 = vld [vmem:[%s304_s6 + $0x4] ss:$8 sps:$4 sm:$0xff]   ;;  %v845_v13 = vld [vmem:[%s956_s27 + $0x70] sm:$0xff]   ;;  %v847_v15 = vld [vmem:[%s956_s27 + $0x78] sm:$0xff]  }
  0x18   : > { %511 = vmatprep.mubr.bf16.mxu0 %v851_v11  ;;  %v846_v14 = vld [vmem:[%s956_s27 + $0x30] sm:$0xff]   ;;  %v848_v16 = vld [vmem:[%s956_s27 + $0x38] sm:$0xff]   ;;  %v849_v17 = vld [vmem:[%s304_s6] ss:$8 sps:$4 sm:$0xff]  }
  0x19   : > { %770 = vmatpush3.bf16.msra.mxu0 %v836_v3  ;;  %v558_v20 = vld [vmem:[%s311_s9 + $0x8] sm:$0xff]  ;;  %v571_v21 = vld [vmem:[%s992_s12] sm:$0xff] }
  0x1a   : > { %771 = vmatprep.subr.bf16.mxu0 %v837_v4  ;;  %566 = vperm.xlu1 %832, %v558_v20   ;;  %v557_v36 = vld [vmem:[%s311_s9] sm:$0xff]  ;;  %v572_v47 = vld [vmem:[%s992_s12 + $0x8] sm:$0xff] }
  0x1d   : > { %772 = vmatpush3.bf16.msra.mxu0 %v838_v5 }
  0x1e   : > { %773 = vmatprep.subr.bf16.mxu0 %v839_v6  ;;  %575 = vperm.xlu1 %832, %v571_v21  }
  0x21   : > { %774 = vmatpush3.bf16.msra.mxu0 %v840_v7 }
  0x22   : > { %775 = vmatprep.subr.bf16.mxu0 %v841_v8 }
  0x25   : > { %776 = vmatpush3.bf16.msra.mxu0 %v842_v9 }
  0x26   : > { %777 = vmatprep.subr.bf16.mxu0 %v843_v10 }
  0x29   : > { %778 = vmatpush3.bf16.msra.mxu0 %v844_v12 }
  0x2a   : > { %779 = vmatprep.subr.bf16.mxu0 %v845_v13 }
  0x2d   : > { %780 = vmatpush3.bf16.msra.mxu0 %v846_v14 }
  0x2e   : > { %781 = vmatprep.subr.bf16.mxu0 %v847_v15 }
  0x31   : > { %782 = vmatpush3.bf16.msra.mxu0 %v848_v16 }
  0x34   : > { %512 = vmatmul.mubr.bf16.vlgmr.msra.gmra.mrb[0].mxu0 %v849_v17 }
  0x99   : > { %v567_v48 = vpop.permute.xlu1 %566 }
  0x9d   : > { %v576_v49 = vpop.permute.xlu1 %575 }
 0x107   : > { %v783_v22 = vpop.f32.mrb[0].mxu0 }
 0x108   : > { %v784_v24 = vpop.f32.mrb[1].mxu0 }
 0x109   : > { %v785_v25 = vadd.f32 %v784_v24, %v783_v22  ;;  %v786_v26 = vpop.f32.mrb[2].mxu0 }
 0x10a   : > { %v787_v28 = vpop.f32.mrb[3].mxu0 }
 0x10b   : > { %v520_v29 = vadd.f32 %v785_v25, %v337_v23  ;;  %v788_v30 = vadd.f32 %v787_v28, %v786_v26 }
 0x10d   : > { %523 = vst.msk [vmem:[#allocation2] sm:$0xff] %vm334_vm0, %v520_v29  ;;  %v521_v31 = vadd.f32 %v788_v30, %v338_v27 }
 0x10f   : > { %524 = vst.msk [vmem:[#allocation2 + $0x8] sm:$0xff] %vm334_vm0, %v521_v31 }
 0x114   : > { %v528_v32 = vld [vmem:[#allocation2] sm:$0xff] }
 0x115   : > { %v530_v33 = vsel %vm334_vm0, %v528_v32, 0.0 }
 0x116   : > { %531 = vadd.xlane.f32.xlu0 %v530_v33  ;;  %v529_v34 = vld [vmem:[#allocation2 + $0x8] sm:$0xff] }
 0x117   : > { %v533_v35 = vsel %vm334_vm0, %v529_v34, 0.0 }
 0x11a   : > { %534 = vadd.xlane.f32.xlu0 %v533_v35 }
 0x130   : > { %561 = vperm.xlu0 %831, %v557_v36  }
 0x1a3   : > { %v532_v37 = vpop.xlane.xlu0 %531 }
 0x1a4   : > { %v537_v38 = vmul.f32 0.015625, %v532_v37 }
 0x1a6   : > { %v539_v39 = vsub.f32 %v528_v32, %v537_v38 }
 0x1a7   : > { %v535_v40 = vpop.xlane.xlu0 %534 }
 0x1a8   : > { %v538_v41 = vmul.f32 0.015625, %v535_v40  ;;  %v541_v42 = vmul.f32 %v539_v39, %v539_v39 }
 0x1aa   : > { %v540_v43 = vsub.f32 %v529_v34, %v538_v41  ;;  %v543_v44 = vsel %vm334_vm0, %v541_v42, 0.0 }
 0x1ab   : > { %544 = vadd.xlane.f32.xlu1 %v543_v44 }
 0x1ac   : > { %v542_v45 = vmul.f32 %v540_v43, %v540_v43 }
 0x1ae   : > { %v546_v46 = vsel %vm334_vm0, %v542_v45, 0.0 }
 0x1af   : > { %547 = vadd.xlane.f32.xlu1 %v546_v46  ;;  %v562_v57 = vpop.permute.xlu0 %561 }
 0x1c0   : > { %580 = vperm.xlu1 %832, %v572_v47  }
 0x238   : > { %v545_v50 = vpop.xlane.xlu1 %544 }
 0x239   : > { %v549_v51 = vmul.f32 0.015625, %v545_v50 }
 0x23b   : > { %v551_v52 = vadd.f32 1e-05, %v549_v51 }
 0x23c   : > { %v548_v53 = vpop.xlane.xlu1 %547 }
 0x23d   : > { %852 = vrsqrt.f32 %v551_v52  ;;  %v550_v54 = vmul.f32 0.015625, %v548_v53 }
 0x23f   : > { %v552_v55 = vadd.f32 1e-05, %v550_v54 }
 0x240   : > { %v581_v1 = vpop.permute.xlu1 %580 }
 0x241   : > { %854 = vrsqrt.f32 %v552_v55 }
 0x247   : > { %v853_v56 = vpop.eup %852 }
 0x248   : > { %v555_v58 = vmul.f32 %v853_v56, %v539_v39 }
 0x24a   : > { %v569_v59 = vmul.f32 %v562_v57, %v555_v58 }
 0x24b   : > { %v855_v60 = vpop.eup %854 }
 0x24c   : > { %v556_v61 = vmul.f32 %v855_v60, %v540_v43  ;;  %v583_v62 = vadd.f32 %v576_v49, %v569_v59 }
 0x24e   : > { %v570_v63 = vmul.f32 %v567_v48, %v556_v61  ;;  %vm585_vm1 = vcmp.ge.f32.partialorder %v583_v62, 0.0  ;;  %v587_v0 = vmul.f32 0.2, %v583_v62 }
 0x250   : > { %v584_v2 = vadd.f32 %v581_v1, %v570_v63  ;;  %v589_v3 = vsel %vm585_vm1, %v583_v62, %v587_v0 }
 0x251   : > { %591 = vst.msk [vmem:[%s327_s16] sm:$0xff] %vm334_vm0, %v589_v3 }
 0x252   : > { %vm586_vm2 = vcmp.ge.f32.partialorder %v584_v2, 0.0  ;;  %v588_v4 = vmul.f32 0.2, %v584_v2 }
 0x254   : > { %v590_v5 = vsel %vm586_vm2, %v584_v2, %v588_v4 }
 0x255   : > { %592 = vst.msk [vmem:[%s327_s16 + $0x8] sm:$0xff] %vm334_vm0, %v590_v5 }
 0x256 PF: > { %s14_s19 = sadd.s32 1, %s894_s19   ;;  %s1028_s15 = smov %s886_s17 }
 0x257   : > { %p11_p7 = scmp.ge.s32.totalorder %s14_s19, 6   ;;  %s1029_s16 = smov %s890_s18 }
 0x258   : > { %s1030_s17 = smov %s1033_s20  ;;  %s1031_s18 = smov %s1037_s21 }
 0x259   :  { %13 = sbr.rel (!%p11_p7) target bundleno = 3 (0x3), region = 83 }

// kernel: discriminator1block_forward.10
= control target key start
LH: loop header
LB: loop body
LE: loop exit
PB: predicated region body
PF: predicated region fallthrough
CT: control target
= control target key end

     0   :  { %s1301_s15 = smov 0   ;;  %s1303_s16 = smov 0   ;;  %s1433_s0 = inlined_call_operand.vmem [shape: bf16[2,512,16], index: 0, kind: input, shape index: {}]   ;;  %s1434_s1 = inlined_call_operand.vmem [shape: bf16[64,512], index: 1, kind: input, shape index: {}]   ;;  %s1435_s2 = inlined_call_operand.vmem [shape: f32[64,1], index: 2, kind: input, shape index: {}]   ;;  %s1436_s3 = inlined_call_operand.vmem [shape: f32[64,1], index: 3, kind: input, shape index: {}]   ;;  %s1437_s4 = inlined_call_operand.vmem [shape: f32[2,64,16], index: 4, kind: output, shape index: {}]  }
   0x1   :  { %s1305_s17 = smov 0   ;;  %s1307_s18 = smov 0  }
   0x2   :  { %s1309_s19 = smov 0  }
   0x3 LB: > { %s29_s20 = sadd.s32 1, %s1264_s17  ;;  %s33_s21 = sadd.s32 1, %s1268_s18  ;;  %s1272_s19 = sphi %s1309_s19, %s14_s19   ;;  %s1268_s18 = sphi %s1307_s18, %s1441_s18   ;;  %s1264_s17 = sphi %s1305_s17, %s1440_s17   ;;  %s1260_s16 = sphi %s1303_s16, %s1439_s16   ;;  %s1256_s15 = sphi %s1301_s15, %s1438_s15  }
   0x4   : > { %p31_p0 = scmp.ge.s32.totalorder %s29_s20, 2  ;;  %p1025_p1 = scmp.ge.s32.totalorder %s1272_s19, 1 }
   0x5   : > { %p231_p2 = scmp.lt.s32.totalorder %s1272_s19, 5 }
   0x6   : > { %s1443_s20 = smov (%p31_p0, %s29_s20), 0  ;;  %s1445_s21 = smov (!%p31_p0, %s33_s21), %s1268_s18 }
   0x7   : > { %p232_p3 = pnand %p1025_p1, %p231_p2  ;;  %p35_p4 = scmp.ge.s32.totalorder %s1445_s21, 2 }
   0x8   : > { %p286_p5 = scmp.lt.s32.totalorder (!%p232_p3), %s1260_s16, 1  ;;  %s1028_s26 = sshll.u32 (!%p232_p3), %s1256_s15, 2  ;;  %vm334_vm0 = vcmask (!%p232_p3), 130048   ;;  %v1274_v40 = vmov (!%p232_p3), 0.0  }
   0x9   : > { %s1447_s21 = smov (%p35_p4, %s1445_s21), 0  ;;  %235 = sbr.rel (%p232_p3) target bundleno = 675 (0x2a3), region = 36 }
   0xa   : > { %p297_p6 = scmp.lt.s32.totalorder (!%p232_p3), %s1028_s26, 7  ;;  %335 = vst.msk [vmem:[#allocation2] sm:$0xff] (!%p232_p3), %vm334_vm0, %v1274_v40  ;;  %336 = vst.msk [vmem:[#allocation2 + $0x8] sm:$0xff] (!%p232_p3), %vm334_vm0, %v1274_v40 }
   0xb   : > { %337 = vst.msk [vmem:[#allocation2 + $0x10] sm:$0xff] (!%p232_p3), %vm334_vm0, %v1274_v40  ;;  %338 = vst.msk [vmem:[#allocation2 + $0x18] sm:$0xff] (!%p232_p3), %vm334_vm0, %v1274_v40 }
  0x10   : > { %s1449_s16 = smov (!%p286_p5, %s1260_s16), 1  ;;  %s1451_s26 = smov (!%p297_p6, %s1028_s26), 7 }
  0x11   : > { %s1080_s22 = sshll.u32 %s1449_s16, 8  ;;  %s1081_s27 = sshll.u32 %s1451_s26, 4  ;;  %v339_v50 = vld [vmem:[#allocation2] sm:$0xff]  ;;  %v340_v55 = vld [vmem:[#allocation2 + $0x8] sm:$0xff] }
  0x12   : > { %s1339_s25 = scalar_lea.vmem %s1433_s0, %s1080_s22  ;;  %s304_s30 = scalar_lea.vmem %s1434_s1, %s1081_s27 }
  0x13   : > { %v1182_v0 = vld [vmem:[%s1339_s25 + $0x40] sm:$0xff]   ;;  %v1186_v4 = vld [vmem:[%s1339_s25 + $0x48] sm:$0xff]   ;;  %v1190_v8 = vld [vmem:[%s1339_s25 + $0x50] sm:$0xff]   ;;  %s1032_s5 = sshll.u32 %s1451_s26, 3  ;;  %s1036_s12 = sshll.u32 %s1449_s16, 3 }
  0x14   : > { %v1183_v1 = vld [vmem:[%s1339_s25 + $0xc0] sm:$0xff]   ;;  %1082 = vmatprep.subr.bf16.mxu0 %v1182_v0  ;;  %v1187_v5 = vld [vmem:[%s1339_s25 + $0xc8] sm:$0xff]   ;;  %v1191_v9 = vld [vmem:[%s1339_s25 + $0xd0] sm:$0xff]   ;;  %s311_s8 = scalar_lea.vmem %s1435_s2, %s1032_s5  ;;  %s317_s11 = scalar_lea.vmem %s1436_s3, %s1032_s5 }
  0x15   : > { %v1184_v2 = vld [vmem:[%s1339_s25] sm:$0xff]   ;;  %1110 = vmatprep.subr.bf16.mxu1 %v1183_v1  ;;  %v1188_v6 = vld [vmem:[%s1339_s25 + $0x8] sm:$0xff]   ;;  %v1192_v10 = vld [vmem:[%s1339_s25 + $0x10] sm:$0xff]   ;;  %s325_s13 = sadd.s32 %s1036_s12, %s1451_s26 }
  0x16   : > { %v1185_v3 = vld [vmem:[%s1339_s25 + $0x80] sm:$0xff]   ;;  %1083 = vmatpush3.bf16.msra.mxu0 %v1184_v2  ;;  %v1189_v7 = vld [vmem:[%s1339_s25 + $0x88] sm:$0xff]   ;;  %v1193_v11 = vld [vmem:[%s1339_s25 + $0x90] sm:$0xff]   ;;  %s1037_s14 = sshll.u32 %s325_s13, 3 }
  0x17   : > { %1111 = vmatpush3.bf16.msra.mxu1 %v1185_v3  ;;  %1084 = vmatprep.subr.bf16.mxu0 %v1186_v4  ;;  %v1194_v12 = vld [vmem:[%s1339_s25 + $0x58] sm:$0xff]   ;;  %v1198_v16 = vld [vmem:[%s1339_s25 + $0x60] sm:$0xff]   ;;  %v1202_v20 = vld [vmem:[%s1339_s25 + $0x68] sm:$0xff]   ;;  %s1408_s23 = scalar_lea.vmem %s1437_s4, %s1037_s14 }
  0x18   : > { %1112 = vmatprep.subr.bf16.mxu1 %v1187_v5  ;;  %v1195_v13 = vld [vmem:[%s1339_s25 + $0xd8] sm:$0xff]   ;;  %v1199_v17 = vld [vmem:[%s1339_s25 + $0xe0] sm:$0xff]   ;;  %v1203_v21 = vld [vmem:[%s1339_s25 + $0xe8] sm:$0xff]  }
  0x19   : > { %v1196_v14 = vld [vmem:[%s1339_s25 + $0x18] sm:$0xff]   ;;  %v1200_v18 = vld [vmem:[%s1339_s25 + $0x20] sm:$0xff]   ;;  %v1204_v22 = vld [vmem:[%s1339_s25 + $0x28] sm:$0xff]  }
  0x1a   : > { %1085 = vmatpush3.bf16.msra.mxu0 %v1188_v6  ;;  %v1197_v15 = vld [vmem:[%s1339_s25 + $0x98] sm:$0xff]   ;;  %v1201_v19 = vld [vmem:[%s1339_s25 + $0xa0] sm:$0xff]   ;;  %v1205_v23 = vld [vmem:[%s1339_s25 + $0xa8] sm:$0xff]  }
  0x1b   : > { %1113 = vmatpush3.bf16.msra.mxu1 %v1189_v7  ;;  %1086 = vmatprep.subr.bf16.mxu0 %v1190_v8  ;;  %v1206_v24 = vld [vmem:[%s1339_s25 + $0x70] sm:$0xff]   ;;  %v1210_v28 = vld [vmem:[%s1339_s25 + $0x78] sm:$0xff]   ;;  %v814_v40 = vld [vmem:[%s311_s8] sm:$0xff] }
  0x1c   : > { %1114 = vmatprep.subr.bf16.mxu1 %v1191_v9  ;;  %v1207_v25 = vld [vmem:[%s1339_s25 + $0xf0] sm:$0xff]   ;;  %v1211_v29 = vld [vmem:[%s1339_s25 + $0xf8] sm:$0xff]  }
  0x1d   : > { %v1208_v26 = vld [vmem:[%s1339_s25 + $0x30] sm:$0xff]   ;;  %v1212_v30 = vld [vmem:[%s1339_s25 + $0x38] sm:$0xff]  }
  0x1e   : > { %1087 = vmatpush3.bf16.msra.mxu0 %v1192_v10  ;;  %v1209_v27 = vld [vmem:[%s1339_s25 + $0xb0] sm:$0xff]   ;;  %v1213_v31 = vld [vmem:[%s1339_s25 + $0xb8] sm:$0xff]  }
  0x1f   : > { %1115 = vmatpush3.bf16.msra.mxu1 %v1193_v11  ;;  %1088 = vmatprep.subr.bf16.mxu0 %v1194_v12  ;;  %v1214_v32 = vld [vmem:[%s304_s30] ss:$16 sps:$4 sm:$0xff]   ;;  %v1216_v33 = vld [vmem:[%s304_s30 + $0x4] ss:$16 sps:$4 sm:$0xff]   ;;  %v1217_v34 = vld [vmem:[%s304_s30 + $0x8] ss:$16 sps:$4 sm:$0xff]  }
  0x20   : > { %1116 = vmatprep.subr.bf16.mxu1 %v1195_v13  ;;  %v1219_v35 = vld [vmem:[%s304_s30 + $0xc] ss:$16 sps:$4 sm:$0xff]   ;;  %679 = vmatprep.mubr.bf16.mxu0 %v1216_v33  ;;  %v1220_v36 = vld [vmem:[%s304_s30 + $0x24] ss:$16 sps:$4 sm:$0xff]   ;;  %v1224_v38 = vld [vmem:[%s304_s30 + $0x20] ss:$16 sps:$4 sm:$0xff]  }
  0x21   : > { %728 = vmatprep.mubr.bf16.mxu1 %v1219_v35  ;;  %v1222_v37 = vld [vmem:[%s304_s30 + $0x2c] ss:$16 sps:$4 sm:$0xff]   ;;  %v1225_v39 = vld [vmem:[%s304_s30 + $0x28] ss:$16 sps:$4 sm:$0xff]   ;;  %v341_v4 = vld [vmem:[#allocation2 + $0x10] sm:$0xff] }
  0x22   : > { %1089 = vmatpush3.bf16.msra.mxu0 %v1196_v14  ;;  %v342_v9 = vld [vmem:[#allocation2 + $0x18] sm:$0xff] }
  0x23   : > { %1117 = vmatpush3.bf16.msra.mxu1 %v1197_v15  ;;  %1090 = vmatprep.subr.bf16.mxu0 %v1198_v16 }
  0x24   : > { %1118 = vmatprep.subr.bf16.mxu1 %v1199_v17 }
  0x26   : > { %1091 = vmatpush3.bf16.msra.mxu0 %v1200_v18 }
  0x27   : > { %1119 = vmatpush3.bf16.msra.mxu1 %v1201_v19  ;;  %1092 = vmatprep.subr.bf16.mxu0 %v1202_v20 }
  0x28   : > { %1120 = vmatprep.subr.bf16.mxu1 %v1203_v21  ;;  %v1275_v21 = vmov 0  }
  0x29   : > { %1181 = vset.pattern.permute.xlu1 %v1275_v21  ;;  %1180 = vset.pattern.permute.xlu0 %v1275_v21 }
  0x2a   : > { %1093 = vmatpush3.bf16.msra.mxu0 %v1204_v22 }
  0x2b   : > { %1121 = vmatpush3.bf16.msra.mxu1 %v1205_v23  ;;  %1094 = vmatprep.subr.bf16.mxu0 %v1206_v24 }
  0x2c   : > { %1122 = vmatprep.subr.bf16.mxu1 %v1207_v25 }
  0x2e   : > { %1095 = vmatpush3.bf16.msra.mxu0 %v1208_v26 }
  0x2f   : > { %1123 = vmatpush3.bf16.msra.mxu1 %v1209_v27  ;;  %1096 = vmatprep.subr.bf16.mxu0 %v1210_v28 }
  0x30   : > { %1124 = vmatprep.subr.bf16.mxu1 %v1211_v29 }
  0x32   : > { %1097 = vmatpush3.bf16.msra.mxu0 %v1212_v30 }
  0x33   : > { %1125 = vmatpush3.bf16.msra.mxu1 %v1213_v31 }
  0x35   : > { %680 = vmatmul.mubr.bf16.vlgmr.msra.gmra.mrb[0].mxu0 %v1214_v32 }
  0x36   : > { %729 = vmatmul.mubr.bf16.vlgmr.msra.gmra.mrb[0].mxu1 %v1217_v34  ;;  %687 = vmatprep.mubr.bf16.mxu0 %v1220_v36 }
  0x37   : > { %736 = vmatprep.mubr.bf16.mxu1 %v1222_v37  ;;  %v815_v37 = vld [vmem:[%s311_s8 + $0x8] sm:$0xff] }
  0x3d   : > { %688 = vmatmul.mubr.bf16.gmra.mrb[4].mxu0 %v1224_v38  ;;  %v816_v38 = vld [vmem:[%s311_s8 + $0x10] sm:$0xff] }
  0x3e   : > { %737 = vmatmul.mubr.bf16.gmra.mrb[4].mxu1 %v1225_v39  ;;  %v817_v39 = vld [vmem:[%s311_s8 + $0x18] sm:$0xff] }
 0x108   : > { %v1098_v41 = vpop.f32.mrb[0].mxu0 }
 0x109   : > { %v1126_v42 = vpop.f32.mrb[0].mxu1  ;;  %v1099_v43 = vpop.f32.mrb[1].mxu0 }
 0x10a   : > { %v1100_v44 = vadd.f32 %v1099_v43, %v1098_v41  ;;  %v1127_v45 = vpop.f32.mrb[1].mxu1  ;;  %v1101_v46 = vpop.f32.mrb[2].mxu0  ;;  %v842_v41 = vld [vmem:[%s317_s11] sm:$0xff]  ;;  %v844_v43 = vld [vmem:[%s317_s11 + $0x10] sm:$0xff] }
 0x10b   : > { %v1128_v47 = vadd.f32 %v1127_v45, %v1126_v42  ;;  %v1129_v48 = vpop.f32.mrb[2].mxu1  ;;  %v1102_v49 = vpop.f32.mrb[3].mxu0  ;;  %v843_v42 = vld [vmem:[%s317_s11 + $0x8] sm:$0xff] }
 0x10c   : > { %v1103_v51 = vadd.f32 %v1102_v49, %v1101_v46  ;;  %v1130_v52 = vpop.f32.mrb[3].mxu1  ;;  %v845_v49 = vld [vmem:[%s317_s11 + $0x18] sm:$0xff] }
 0x10d   : > { %v731_v53 = vadd.f32 %v1128_v47, %v1100_v44  ;;  %v1131_v54 = vadd.f32 %v1130_v52, %v1129_v48 }
 0x10f   : > { %v745_v56 = vadd.f32 %v731_v53, %v339_v50  ;;  %v734_v57 = vadd.f32 %v1131_v54, %v1103_v51 }
 0x110   : > { %v1104_v58 = vpop.f32.mrb[4].mxu0 }
 0x111   : > { %750 = vst.msk [vmem:[#allocation2] sm:$0xff] %vm334_vm0, %v745_v56  ;;  %v746_v59 = vadd.f32 %v734_v57, %v340_v55  ;;  %v1132_v60 = vpop.f32.mrb[4].mxu1  ;;  %v1105_v61 = vpop.f32.mrb[5].mxu0 }
 0x112   : > { %v1106_v62 = vadd.f32 %v1105_v61, %v1104_v58  ;;  %v1133_v63 = vpop.f32.mrb[5].mxu1  ;;  %v1107_v0 = vpop.f32.mrb[6].mxu0 }
 0x113   : > { %751 = vst.msk [vmem:[#allocation2 + $0x8] sm:$0xff] %vm334_vm0, %v746_v59  ;;  %v1134_v1 = vadd.f32 %v1133_v63, %v1132_v60  ;;  %v1135_v2 = vpop.f32.mrb[6].mxu1  ;;  %v1108_v3 = vpop.f32.mrb[7].mxu0 }
 0x114   : > { %v1109_v5 = vadd.f32 %v1108_v3, %v1107_v0  ;;  %v1136_v6 = vpop.f32.mrb[7].mxu1 }
 0x115   : > { %v739_v7 = vadd.f32 %v1134_v1, %v1106_v62  ;;  %v1137_v8 = vadd.f32 %v1136_v6, %v1135_v2 }
 0x117   : > { %v747_v10 = vadd.f32 %v739_v7, %v341_v4  ;;  %v742_v11 = vadd.f32 %v1137_v8, %v1109_v5 }
 0x118   : > { %v757_v12 = vld [vmem:[#allocation2] sm:$0xff] }
 0x119   : > { %752 = vst.msk [vmem:[#allocation2 + $0x10] sm:$0xff] %vm334_vm0, %v747_v10  ;;  %v748_v13 = vadd.f32 %v742_v11, %v342_v9  ;;  %v761_v14 = vsel %vm334_vm0, %v757_v12, 0.0 }
 0x11a   : > { %762 = vadd.xlane.f32.xlu0 %v761_v14  ;;  %v758_v15 = vld [vmem:[#allocation2 + $0x8] sm:$0xff] }
 0x11b   : > { %753 = vst.msk [vmem:[#allocation2 + $0x18] sm:$0xff] %vm334_vm0, %v748_v13  ;;  %v764_v16 = vsel %vm334_vm0, %v758_v15, 0.0 }
 0x11e   : > { %765 = vadd.xlane.f32.xlu0 %v764_v16 }
 0x120   : > { %v759_v17 = vld [vmem:[#allocation2 + $0x10] sm:$0xff] }
 0x121   : > { %v767_v18 = vsel %vm334_vm0, %v759_v17, 0.0 }
 0x122   : > { %768 = vadd.xlane.f32.xlu1 %v767_v18  ;;  %v760_v19 = vld [vmem:[#allocation2 + $0x18] sm:$0xff] }
 0x123   : > { %v770_v20 = vsel %vm334_vm0, %v760_v19, 0.0 }
 0x126   : > { %771 = vadd.xlane.f32.xlu1 %v770_v20 }
 0x1a7   : > { %v763_v22 = vpop.xlane.xlu0 %762 }
 0x1a8   : > { %v774_v23 = vmul.f32 0.0625, %v763_v22 }
 0x1aa   : > { %v778_v24 = vsub.f32 %v757_v12, %v774_v23 }
 0x1ab   : > { %v766_v25 = vpop.xlane.xlu0 %765 }
 0x1ac   : > { %v775_v26 = vmul.f32 0.0625, %v766_v25  ;;  %v782_v27 = vmul.f32 %v778_v24, %v778_v24 }
 0x1ae   : > { %v779_v28 = vsub.f32 %v758_v15, %v775_v26  ;;  %v786_v29 = vsel %vm334_vm0, %v782_v27, 0.0 }
 0x1af   : > { %v769_v30 = vpop.xlane.xlu1 %768  ;;  %787 = vadd.xlane.f32.xlu0 %v786_v29 }
 0x1b0   : > { %v776_v31 = vmul.f32 0.0625, %v769_v30  ;;  %v783_v32 = vmul.f32 %v779_v28, %v779_v28 }
 0x1b2   : > { %v780_v33 = vsub.f32 %v759_v17, %v776_v31  ;;  %v789_v34 = vsel %vm334_vm0, %v783_v32, 0.0 }
 0x1b3   : > { %790 = vadd.xlane.f32.xlu1 %v789_v34  ;;  %v772_v44 = vpop.xlane.xlu1 %771 }
 0x1b4   : > { %v784_v35 = vmul.f32 %v780_v33, %v780_v33  ;;  %v777_v45 = vmul.f32 0.0625, %v772_v44 }
 0x1b6   : > { %v792_v36 = vsel %vm334_vm0, %v784_v35, 0.0  ;;  %v781_v46 = vsub.f32 %v760_v19, %v777_v45 }
 0x1b7   : > { %793 = vadd.xlane.f32.xlu0 %v792_v36 }
 0x1b8   : > { %v785_v47 = vmul.f32 %v781_v46, %v781_v46 }
 0x1ba   : > { %v795_v48 = vsel %vm334_vm0, %v785_v47, 0.0 }
 0x1c4   : > { %825 = vperm.xlu1 %1181, %v815_v37  }
 0x1c8   : > { %830 = vperm.xlu1 %1181, %v816_v38  }
 0x1cc   : > { %835 = vperm.xlu1 %1181, %v817_v39  }
 0x1cd   : > { %820 = vperm.xlu0 %1180, %v814_v40  }
 0x1d0   : > { %848 = vperm.xlu1 %1181, %v842_v41  }
 0x1d4   : > { %853 = vperm.xlu1 %1181, %v843_v42  }
 0x1d8   : > { %858 = vperm.xlu1 %1181, %v844_v43  }
 0x1fc   : > { %796 = vadd.xlane.f32.xlu1 %v795_v48 }
 0x20d   : > { %863 = vperm.xlu1 %1181, %v845_v49  }
 0x23c   : > { %v788_v50 = vpop.xlane.xlu0 %787 }
 0x23d   : > { %v798_v51 = vmul.f32 0.0625, %v788_v50 }
 0x23f   : > { %v802_v52 = vadd.f32 1e-05, %v798_v51 }
 0x240   : > { %v791_v53 = vpop.xlane.xlu1 %790 }
 0x241   : > { %1226 = vrsqrt.f32 %v802_v52  ;;  %v799_v54 = vmul.f32 0.0625, %v791_v53 }
 0x243   : > { %v803_v55 = vadd.f32 1e-05, %v799_v54 }
 0x244   : > { %v826_v56 = vpop.permute.xlu1 %825  ;;  %v794_v57 = vpop.xlane.xlu0 %793 }
 0x245   : > { %1228 = vrsqrt.f32 %v803_v55  ;;  %v800_v58 = vmul.f32 0.0625, %v794_v57 }
 0x247   : > { %v804_v59 = vadd.f32 1e-05, %v800_v58 }
 0x248   : > { %v831_v60 = vpop.permute.xlu1 %830 }
 0x249   : > { %1230 = vrsqrt.f32 %v804_v59 }
 0x24b   : > { %v1227_v61 = vpop.eup %1226 }
 0x24c   : > { %v836_v62 = vpop.permute.xlu1 %835  ;;  %v810_v63 = vmul.f32 %v1227_v61, %v778_v24  ;;  %v821_v0 = vpop.permute.xlu0 %820 }
 0x24e   : > { %v838_v1 = vmul.f32 %v821_v0, %v810_v63 }
 0x24f   : > { %v1229_v2 = vpop.eup %1228 }
 0x250   : > { %v811_v3 = vmul.f32 %v1229_v2, %v779_v28  ;;  %v849_v4 = vpop.permute.xlu1 %848 }
 0x251   : > { %v866_v5 = vadd.f32 %v849_v4, %v838_v1 }
 0x252   : > { %v839_v6 = vmul.f32 %v826_v56, %v811_v3 }
 0x253   : > { %v1231_v7 = vpop.eup %1230  ;;  %vm870_vm1 = vcmp.ge.f32.partialorder %v866_v5, 0.0  ;;  %v874_v8 = vmul.f32 0.2, %v866_v5 }
 0x254   : > { %v812_v9 = vmul.f32 %v1231_v7, %v780_v33  ;;  %v854_v10 = vpop.permute.xlu1 %853 }
 0x255   : > { %v878_v11 = vsel %vm870_vm1, %v866_v5, %v874_v8  ;;  %v867_v12 = vadd.f32 %v854_v10, %v839_v6 }
 0x256   : > { %v840_v13 = vmul.f32 %v831_v60, %v812_v9  ;;  %882 = vst.msk [vmem:[%s1408_s23] sm:$0xff] %vm334_vm0, %v878_v11 }
 0x257   : > { %vm871_vm2 = vcmp.ge.f32.partialorder %v867_v12, 0.0  ;;  %v875_v14 = vmul.f32 0.2, %v867_v12 }
 0x258   : > { %v859_v15 = vpop.permute.xlu1 %858 }
 0x259   : > { %v879_v16 = vsel %vm871_vm2, %v867_v12, %v875_v14  ;;  %v868_v17 = vadd.f32 %v859_v15, %v840_v13 }
 0x25a   : > { %883 = vst.msk [vmem:[%s1408_s23 + $0x8] sm:$0xff] %vm334_vm0, %v879_v16 }
 0x25b   : > { %vm872_vm3 = vcmp.ge.f32.partialorder %v868_v17, 0.0  ;;  %v876_v18 = vmul.f32 0.2, %v868_v17 }
 0x25d   : > { %v880_v19 = vsel %vm872_vm3, %v868_v17, %v876_v18 }
 0x25e   : > { %884 = vst.msk [vmem:[%s1408_s23 + $0x10] sm:$0xff] %vm334_vm0, %v880_v19 }
 0x289   : > { %v797_v20 = vpop.xlane.xlu1 %796 }
 0x28a   : > { %v801_v21 = vmul.f32 0.0625, %v797_v20 }
 0x28c   : > { %v805_v22 = vadd.f32 1e-05, %v801_v21 }
 0x28d   : > { %v864_v26 = vpop.permute.xlu1 %863 }
 0x28e   : > { %1232 = vrsqrt.f32 %v805_v22 }
 0x298   : > { %v1233_v23 = vpop.eup %1232 }
 0x299   : > { %v813_v24 = vmul.f32 %v1233_v23, %v781_v46 }
 0x29b   : > { %v841_v25 = vmul.f32 %v836_v62, %v813_v24 }
 0x29d   : > { %v869_v27 = vadd.f32 %v864_v26, %v841_v25 }
 0x29f   : > { %vm873_vm4 = vcmp.ge.f32.partialorder %v869_v27, 0.0  ;;  %v877_v28 = vmul.f32 0.2, %v869_v27 }
 0x2a1   : > { %v881_v29 = vsel %vm873_vm4, %v869_v27, %v877_v28 }
 0x2a2   : > { %885 = vst.msk [vmem:[%s1408_s23 + $0x18] sm:$0xff] %vm334_vm0, %v881_v29 }
 0x2a3 PF: > { %s14_s19 = sadd.s32 1, %s1272_s19   ;;  %s1438_s15 = smov %s1264_s17 }
 0x2a4   : > { %p11_p7 = scmp.ge.s32.totalorder %s14_s19, 6   ;;  %s1439_s16 = smov %s1268_s18 }
 0x2a5   : > { %s1440_s17 = smov %s1443_s20  ;;  %s1441_s18 = smov %s1447_s21 }
 0x2a6   :  { %13 = sbr.rel (!%p11_p7) target bundleno = 3 (0x3), region = 83 }

// kernel: discriminator1block_forward.11
= control target key start
LH: loop header
LB: loop body
LE: loop exit
PB: predicated region body
PF: predicated region fallthrough
CT: control target
= control target key end

     0   :  { %s979_s14 = smov 0   ;;  %s981_s15 = smov 0   ;;  %s1090_s0 = inlined_call_operand.vmem [shape: bf16[2,1024,1], index: 0, kind: input, shape index: {}]   ;;  %s1091_s1 = inlined_call_operand.vmem [shape: bf16[1,1024], index: 1, kind: input, shape index: {}]   ;;  %s1092_s2 = inlined_call_operand.<no memory space> [shape: f32[1,1], index: 2, kind: input, shape index: {}]   ;;  %s1093_s3 = inlined_call_operand.vmem [shape: f32[2,1,1], index: 3, kind: output, shape index: {}]  }
   0x1   :  { %v8_v0 = vstv %s1092_s2  ;;  %s983_s16 = smov 0   ;;  %s985_s17 = smov 0  }
   0x2   :  { %9 = vst [vmem:[#allocation3] sm:$0x1] %v8_v0  ;;  %s987_s18 = smov 0  }
   0x3 LB: > { %s27_s2 = sadd.s32 1, %s944_s16  ;;  %s34_s19 = sadd.s32 1, %s948_s17  ;;  %s952_s18 = sphi %s987_s18, %s15_s18   ;;  %s948_s17 = sphi %s985_s17, %s1097_s17   ;;  %s944_s16 = sphi %s983_s16, %s1096_s16   ;;  %s940_s15 = sphi %s981_s15, %s1095_s15   ;;  %s936_s14 = sphi %s979_s14, %s1094_s14  }
   0x4   : > { %p28_p0 = scmp.ge.s32.totalorder %s27_s2, 2  ;;  %p754_p1 = scmp.ge.s32.totalorder %s952_s18, 1 }
   0x5   : > { %p191_p2 = scmp.lt.s32.totalorder %s952_s18, 5 }
   0x6   : > { %s1099_s2 = smov (%p28_p0, %s27_s2), 0  ;;  %s1101_s19 = smov (!%p28_p0, %s34_s19), %s948_s17 }
   0x7   : > { %p192_p3 = pnand %p754_p1, %p191_p2  ;;  %p36_p4 = scmp.ge.s32.totalorder %s1101_s19, 2 }
   0x8   : > { %s755_s20 = sshll.u32 (!%p192_p3), %s936_s14, 6  ;;  %p232_p5 = scmp.lt.s32.totalorder (!%p192_p3), %s940_s15, 1 }
   0x9   : > { %s1103_s19 = smov (%p36_p4, %s1101_s19), 0  ;;  %195 = sbr.rel (%p192_p3) target bundleno = 292 (0x124), region = 32 }
   0xa   : > { %p234_p6 = scmp.lt.s32.totalorder (!%p192_p3), %s755_s20, 127  ;;  %s758_s21 = sshll.u32 (!%p192_p3), %s936_s14, 2 }
   0xb   : > { %p244_p7 = scmp.lt.s32.totalorder (!%p192_p3), %s758_s21, 7  ;;  %p759_p8 = scmp.ne.s32.totalorder (!%p192_p3), %s936_s14, 0 }
  0x10   : > { %s1105_s15 = smov (!%p232_p5, %s940_s15), 1  ;;  %s1107_s20 = smov (!%p234_p6, %s755_s20), 127 }
  0x11   : > { %s756_s22 = sshll.u32 %s1105_s15, 7  ;;  %s258_s26 = scalar_lea.vmem %s1093_s3, %s1105_s15  ;;  %vm264_vm0 = vcmask (!%p759_p8), 0   ;;  %v954_v1 = vmov (!%p759_p8), 0.0  }
  0x12   : > { %s237_s23 = sadd.s32 %s756_s22, %s1107_s20  ;;  %s1109_s21 = smov (!%p244_p7, %s758_s21), 7  ;;  %265 = vst.msk [vmem:[#allocation2] sm:$0x1] (!%p759_p8), %vm264_vm0, %v954_v1 }
  0x13   : > { %s757_s27 = sshll.u32 %s237_s23, 2  ;;  %s248_s6 = scalar_lea.vmem %s1091_s1, %s1109_s21 }
  0x14   : > { %s1023_s30 = scalar_lea.vmem %s1090_s0, %s757_s27  ;;  %263 = sbr.rel (%p759_p8) target bundleno = 27 (0x1b), region = 36 }
  0x1b PF: > { %v882_v2 = vld [vmem:[%s1023_s30 + $0x40] sm:$0xff]   ;;  %v886_v6 = vld [vmem:[%s1023_s30 + $0x48] sm:$0xff]   ;;  %v890_v10 = vld [vmem:[%s1023_s30 + $0x50] sm:$0xff]   ;;  %v344_v32 = vlaneseq  ;;  %v955_v36 = vmov 1966171168   ;;  %vm634_vm1 = vcmask 0  }
  0x1c   : > { %v883_v3 = vld [vmem:[%s1023_s30 + $0xc0] sm:$0xff]   ;;  %796 = vmatprep.subr.bf16.mxu0 %v882_v2  ;;  %v887_v7 = vld [vmem:[%s1023_s30 + $0xc8] sm:$0xff]   ;;  %v891_v11 = vld [vmem:[%s1023_s30 + $0xd0] sm:$0xff]   ;;  %v342_v37 = vunpack.c.l.s4 %v955_v36  ;;  %p793_p9 = scmp.ne.s32.totalorder %s936_s14, 1 }
  0x1d   : > { %v884_v4 = vld [vmem:[%s1023_s30] sm:$0xff]   ;;  %818 = vmatprep.subr.bf16.mxu1 %v883_v3  ;;  %v888_v8 = vld [vmem:[%s1023_s30 + $0x8] sm:$0xff]   ;;  %v892_v12 = vld [vmem:[%s1023_s30 + $0x10] sm:$0xff]   ;;  %v345_v38 = vshrl.u32 %v344_v32, 7 }
  0x1e   : > { %v885_v5 = vld [vmem:[%s1023_s30 + $0x80] sm:$0xff]   ;;  %797 = vmatpush3.bf16.msra.mxu0 %v884_v4  ;;  %v889_v9 = vld [vmem:[%s1023_s30 + $0x88] sm:$0xff]   ;;  %v893_v13 = vld [vmem:[%s1023_s30 + $0x90] sm:$0xff]   ;;  %v343_v40 = vunpack.c.0.s8 %v342_v37 }
  0x1f   : > { %819 = vmatpush3.bf16.msra.mxu1 %v885_v5  ;;  %798 = vmatprep.subr.bf16.mxu0 %v886_v6  ;;  %v894_v14 = vld [vmem:[%s1023_s30 + $0x58] sm:$0xff]   ;;  %v898_v18 = vld [vmem:[%s1023_s30 + $0x60] sm:$0xff]   ;;  %v902_v22 = vld [vmem:[%s1023_s30 + $0x68] sm:$0xff]  }
  0x20   : > { %820 = vmatprep.subr.bf16.mxu1 %v887_v7  ;;  %v895_v15 = vld [vmem:[%s1023_s30 + $0xd8] sm:$0xff]   ;;  %v899_v19 = vld [vmem:[%s1023_s30 + $0xe0] sm:$0xff]   ;;  %v903_v23 = vld [vmem:[%s1023_s30 + $0xe8] sm:$0xff]   ;;  %v346_v41 = vsub.s32 %v343_v40, %v345_v38 }
  0x21   : > { %v896_v16 = vld [vmem:[%s1023_s30 + $0x18] sm:$0xff]   ;;  %v900_v20 = vld [vmem:[%s1023_s30 + $0x20] sm:$0xff]   ;;  %v904_v24 = vld [vmem:[%s1023_s30 + $0x28] sm:$0xff]  }
  0x22   : > { %799 = vmatpush3.bf16.msra.mxu0 %v888_v8  ;;  %v897_v17 = vld [vmem:[%s1023_s30 + $0x98] sm:$0xff]   ;;  %v901_v21 = vld [vmem:[%s1023_s30 + $0xa0] sm:$0xff]   ;;  %v905_v25 = vld [vmem:[%s1023_s30 + $0xa8] sm:$0xff]  }
  0x23   : > { %821 = vmatpush3.bf16.msra.mxu1 %v889_v9  ;;  %800 = vmatprep.subr.bf16.mxu0 %v890_v10  ;;  %v906_v26 = vld [vmem:[%s1023_s30 + $0x70] sm:$0xff]   ;;  %v910_v30 = vld [vmem:[%s1023_s30 + $0x78] sm:$0xff]   ;;  %v760_v35 = vld.sshfl [vmem:[%s248_s6] sm:$0x33 pattern:$0x75316420] }
  0x24   : > { %822 = vmatprep.subr.bf16.mxu1 %v891_v11  ;;  %v907_v27 = vld [vmem:[%s1023_s30 + $0xf0] sm:$0xff]   ;;  %v911_v31 = vld [vmem:[%s1023_s30 + $0xf8] sm:$0xff]   ;;  %v340_v39 = vcombine.high %v760_v35, %v760_v35  ;;  %v347_v43 = vrot.slane %v760_v35, %v346_v41  ;;  %v266_v55 = vld [vmem:[#allocation2] sm:$0x1] }
  0x25   : > { %v908_v28 = vld [vmem:[%s1023_s30 + $0x30] sm:$0xff]   ;;  %v912_v33 = vld [vmem:[%s1023_s30 + $0x38] sm:$0xff]   ;;  %v641_v60 = vld [vmem:[#allocation3] sm:$0x1] (!%p793_p9) }
  0x26   : > { %801 = vmatpush3.bf16.msra.mxu0 %v892_v12  ;;  %v909_v29 = vld [vmem:[%s1023_s30 + $0xb0] sm:$0xff]   ;;  %v913_v34 = vld [vmem:[%s1023_s30 + $0xb8] sm:$0xff]   ;;  %v354_v42 = vrot.slane %v340_v39, %v346_v41  ;;  %v355_v45 = vcombine.high %v347_v43, %v347_v43 }
  0x27   : > { %823 = vmatpush3.bf16.msra.mxu1 %v893_v13  ;;  %802 = vmatprep.subr.bf16.mxu0 %v894_v14 }
  0x28   : > { %824 = vmatprep.subr.bf16.mxu1 %v895_v15  ;;  %585 = vmatprep.mubr.bf16.mxu0 %v354_v42  ;;  %v356_v44 = vcombine.high %v354_v42, %v354_v42 }
  0x2a   : > { %803 = vmatpush3.bf16.msra.mxu0 %v896_v16  ;;  %625 = vmatprep.mubr.bf16.mxu1 %v356_v44 }
  0x2b   : > { %825 = vmatpush3.bf16.msra.mxu1 %v897_v17  ;;  %804 = vmatprep.subr.bf16.mxu0 %v898_v18 }
  0x2c   : > { %826 = vmatprep.subr.bf16.mxu1 %v899_v19 }
  0x2e   : > { %805 = vmatpush3.bf16.msra.mxu0 %v900_v20 }
  0x2f   : > { %827 = vmatpush3.bf16.msra.mxu1 %v901_v21  ;;  %806 = vmatprep.subr.bf16.mxu0 %v902_v22 }
  0x30   : > { %828 = vmatprep.subr.bf16.mxu1 %v903_v23 }
  0x32   : > { %807 = vmatpush3.bf16.msra.mxu0 %v904_v24 }
  0x33   : > { %829 = vmatpush3.bf16.msra.mxu1 %v905_v25  ;;  %808 = vmatprep.subr.bf16.mxu0 %v906_v26 }
  0x34   : > { %830 = vmatprep.subr.bf16.mxu1 %v907_v27 }
  0x36   : > { %809 = vmatpush3.bf16.msra.mxu0 %v908_v28 }
  0x37   : > { %831 = vmatpush3.bf16.msra.mxu1 %v909_v29  ;;  %810 = vmatprep.subr.bf16.mxu0 %v910_v30 }
  0x38   : > { %832 = vmatprep.subr.bf16.mxu1 %v911_v31 }
  0x3a   : > { %811 = vmatpush3.bf16.msra.mxu0 %v912_v33 }
  0x3b   : > { %833 = vmatpush3.bf16.msra.mxu1 %v913_v34 }
  0x3d   : > { %586 = vmatmul.mubr.bf16.vlgmr.msra.gmra.mrb[0].mxu0 %v347_v43 }
  0x3e   : > { %626 = vmatmul.mubr.bf16.vlgmr.msra.gmra.mrb[0].mxu1 %v355_v45 }
 0x110   : > { %v812_v46 = vpop.f32.mrb[0].mxu0 }
 0x111   : > { %v813_v47 = vpop.f32.mrb[1].mxu0  ;;  %v834_v48 = vpop.f32.mrb[0].mxu1 }
 0x112   : > { %v814_v49 = vadd.f32 %v813_v47, %v812_v46  ;;  %v815_v50 = vpop.f32.mrb[2].mxu0  ;;  %v835_v51 = vpop.f32.mrb[1].mxu1 }
 0x113   : > { %v816_v52 = vpop.f32.mrb[3].mxu0  ;;  %v836_v53 = vadd.f32 %v835_v51, %v834_v48  ;;  %v837_v54 = vpop.f32.mrb[2].mxu1  ;;  %639 = sbr.rel (%p793_p9) target bundleno = 292 (0x124), region = 40 }
 0x114   : > { %v838_v56 = vpop.f32.mrb[3].mxu1 }
 0x115   : > { %v628_v57 = vadd.f32 %v836_v53, %v814_v49 }
 0x117   : > { %v633_v58 = vadd.f32 %v628_v57, %v266_v55 }
 0x119   : > { %635 = vst.msk [vmem:[#allocation2] sm:$0x1] %vm634_vm1, %v633_v58 }
 0x120   : > { %v640_v59 = vld [vmem:[#allocation2] sm:$0x1] }
 0x121   : > { %v642_v61 = vadd.f32 %v641_v60, %v640_v59 }
 0x123   : > { %643 = vst.msk [vmem:[%s258_s26] sm:$0x1] %vm634_vm1, %v642_v61 }
 0x124 PF: > { %s15_s18 = sadd.s32 1, %s952_s18   ;;  %s1094_s14 = smov %s944_s16 }
 0x125   : > { %p12_p10 = scmp.ge.s32.totalorder %s15_s18, 6   ;;  %s1095_s15 = smov %s948_s17 }
 0x126   : > { %s1096_s16 = smov %s1099_s2  ;;  %s1097_s17 = smov %s1103_s19 }
 0x127   :  { %14 = sbr.rel (!%p12_p10) target bundleno = 3 (0x3), region = 76 }

</bundles_post_ra>
